<compile_context>
chip_gen: v7x
topology: tpu7x:2x2x1
jax: 0.10.0
libtpu: 0.0.40
codegen_flags: <defaults>
</compile_context>

<pallas_src>
import functools

import jax
import jax.numpy as jnp
from jax import lax
from jax.experimental import pallas as pl
from jax.experimental.pallas import tpu as pltpu


def _bilstm_nli_kernel(x_ref, wx_ref, whh_ref, b_ref, wl_ref, bl_ref, out_ref,
                       *, T, B, H, L):
    """Fused two-sentence bidirectional LSTM + label head.

    x_ref:   (2*T*B, E)  embedded sentence1 rows (T*B) then sentence2 rows (T*B)
    wx_ref:  (E, 8H)     [W_ih_fwd^T | W_ih_bwd^T]
    whh_ref: (H, 8H)     [W_hh_fwd^T | W_hh_bwd^T]
    b_ref:   (1, 8H)     [b_ih_f + b_hh_f | b_ih_b + b_hh_b]
    wl_ref:  (4H, LP)    hidden2label weight^T, lane-padded (pad cols = 0)
    bl_ref:  (1, LP)     hidden2label bias, pad lanes = -1e30
    out_ref: (B, L)      log-probabilities
    """
    H4 = 4 * H
    TB = T * B

    # Hoisted input projection: ONE MXU matmul for both sentences and both
    # directions, fused bias added once; entirely off the recurrence crit path.
    # (The dead backward columns of sentence-2 rows 0..T-2 ride along for free;
    # splitting them out would cost extra matmul issues for no crit-path gain.)
    gx = (jnp.dot(x_ref[...], wx_ref[...], preferred_element_type=jnp.float32)
          + b_ref[...])                                            # (2TB, 8H)

    whh = whh_ref[...]                                             # (H, 8H)
    whh_f = whh[:, :H4]                                            # (H, 4H)
    whh_b = whh[:, H4:]                                            # (H, 4H)

    # Pre-slice every per-step gate-input slab (depends only on gx -> hoisted
    # off the serial critical path by the scheduler).
    # Phase-1 slabs pack [fwd input @ time t ; bwd input @ time T-1-t] on sublanes.
    gx1p = [jnp.concatenate([gx[t * B:(t + 1) * B],
                             gx[(T - 1 - t) * B:(T - t) * B]], axis=0)
            for t in range(T)]                                     # each (2B, 8H)
    gx2f = [gx[TB + t * B: TB + (t + 1) * B, :H4] for t in range(T)]   # (B, 4H)
    gx2b_last = gx[TB + (T - 1) * B: TB + T * B, H4:]              # (B, 4H)

    def cell_update(sig4, tnh4, c_prev):
        # sig4 / tnh4: sigmoid / tanh of an i|f|g|o gate slab, shape (B, 4H)
        c = sig4[:, H:2 * H] * c_prev + sig4[:, 0:H] * tnh4[:, 2 * H:3 * H]
        h = sig4[:, 3 * H:4 * H] * jnp.tanh(c)
        return h, c

    zero = jnp.zeros((B, H), jnp.float32)

    # ---- phase 1: sentence-1 forward AND backward recurrences packed into the
    # same T unrolled steps (backward walks time T-1..0). One (2B,H)@(H,8H)
    # matmul per step serves both directions on otherwise idle sublanes.
    h_f, c_f = zero, zero
    h_b, c_b = zero, zero
    hb1_out = zero
    for t in range(T):
        hp = jnp.concatenate([h_f, h_b], axis=0)                   # (2B, H)
        gates = gx1p[t] + jnp.dot(hp, whh,
                                  preferred_element_type=jnp.float32)  # (2B, 8H)
        sig = jax.nn.sigmoid(gates)     # whole-slab EUP pushes
        tnh = jnp.tanh(gates)
        h_f, c_f = cell_update(sig[:B, :H4], tnh[:B, :H4], c_f)
        h_b, c_b = cell_update(sig[B:, H4:], tnh[B:, H4:], c_b)
        if t == 0:
            hb1_out = h_b   # backward output at time T-1 == lstm_out1[-1][:, H:]
    hf1_out = h_f           # forward output at time T-1  == lstm_out1[-1][:, :H]

    # ---- phase 2a: sentence-2 forward recurrence, state carried from sentence 1.
    for t in range(T):
        gates = gx2f[t] + jnp.dot(h_f, whh_f,
                                  preferred_element_type=jnp.float32)  # (B, 4H)
        h_f, c_f = cell_update(jax.nn.sigmoid(gates), jnp.tanh(gates), c_f)
    hf2_out = h_f

    # ---- phase 2b: sentence-2 backward output at time T-1 is ONE step from the
    # carried sentence-1 backward final state; independent of phase 2a -> overlaps.
    gates_b2 = gx2b_last + jnp.dot(h_b, whh_b,
                                   preferred_element_type=jnp.float32)
    hb2_out, _ = cell_update(jax.nn.sigmoid(gates_b2), jnp.tanh(gates_b2), c_b)

    # ---- fused head: Linear(4H -> L) + log_softmax on a lane-padded slab
    # (padding logits are -1e30 -> exp underflows to 0), so the lane reduce is
    # dense; only the tiny final (B, L) store is masked.
    feat = jnp.concatenate([hf1_out, hb1_out, hf2_out, hb2_out], axis=1)  # (B, 4H)
    logits = (jnp.dot(feat, wl_ref[...], preferred_element_type=jnp.float32)
              + bl_ref[...])                                       # (B, LP)
    z = logits - jnp.max(logits, axis=-1, keepdims=True)
    logp = z - jnp.log(jnp.sum(jnp.exp(z), axis=-1, keepdims=True))
    out_ref[...] = logp[:, :L]


def prepare_bilstm_nli_params(wih_f, whh_f, bih_f, bhh_f,
                              wih_b, whh_b, bih_b, bhh_b,
                              w_label, b_label):
    """One-time parameter packing (PyTorch layout in, kernel layout out)."""
    H = whh_f.shape[1]
    L = w_label.shape[0]
    LP = max(128, -(-L // 128) * 128)                              # lane-pad head
    wx = jnp.concatenate([wih_f.T, wih_b.T], axis=1)               # (E, 8H)
    whh = jnp.concatenate([whh_f.T, whh_b.T], axis=1)              # (H, 8H)
    b = jnp.concatenate([bih_f + bhh_f, bih_b + bhh_b]).reshape(1, 8 * H)
    wl = jnp.zeros((4 * H, LP), jnp.float32).at[:, :L].set(w_label.T)
    bl = jnp.full((1, LP), -1e30, jnp.float32).at[0, :L].set(b_label)
    return (wx.astype(jnp.float32), whh.astype(jnp.float32),
            b.astype(jnp.float32), wl, bl)


def bilstm_nli_forward(sentence1, sentence2, emb_table, wx, whh, b, wl, bl,
                       *, label_size):
    """sentence1/sentence2: (T, B) int32 token ids -> (B, label_size) log-probs."""
    T, B = sentence1.shape
    H = whh.shape[0]
    # Gate slabs must be lane-tile aligned for the static lane slicing below.
    assert (4 * H) % 128 == 0, "hidden_dim must be a multiple of 32"

    # Embedding lookup (a gather) stays in XLA; everything downstream is fused
    # into one grid-less pallas_call (resident footprint ~tens of KiB, far under
    # VMEM limits on v5e/v6e/v7x, so grid steps would be pure overhead).
    x1 = jnp.take(emb_table, sentence1.reshape(-1), axis=0)        # (T*B, E)
    x2 = jnp.take(emb_table, sentence2.reshape(-1), axis=0)        # (T*B, E)
    x_all = jnp.concatenate([x1, x2], axis=0).astype(jnp.float32)  # (2*T*B, E)

    kernel = functools.partial(_bilstm_nli_kernel, T=T, B=B, H=H, L=label_size)
    vmem = pl.BlockSpec(memory_space=pltpu.MemorySpace.VMEM)
    return pl.pallas_call(
        kernel,
        out_shape=jax.ShapeDtypeStruct((B, label_size), jnp.float32),
        in_specs=[vmem] * 6,
        out_specs=vmem,
    )(x_all, wx, whh, b, wl, bl)


def _reference(sentence1, sentence2, emb_table,
               wih_f, whh_f, bih_f, bhh_f, wih_b, whh_b, bih_b, bhh_b,
               w_label, b_label):
    """Pure-JAX mirror of the intended PyTorch forward (zero initial hidden)."""
    T, B = sentence1.shape
    H = whh_f.shape[1]
    x1 = emb_table[sentence1.reshape(-1)].reshape(T, B, -1)
    x2 = emb_table[sentence2.reshape(-1)].reshape(T, B, -1)

    def cell(params, carry, x_t):
        wih, whh, bih, bhh = params
        h, c = carry
        gates = x_t @ wih.T + bih + h @ whh.T + bhh
        i_g = jax.nn.sigmoid(gates[:, 0:H])
        f_g = jax.nn.sigmoid(gates[:, H:2 * H])
        g_g = jnp.tanh(gates[:, 2 * H:3 * H])
        o_g = jax.nn.sigmoid(gates[:, 3 * H:4 * H])
        c_new = f_g * c + i_g * g_g
        h_new = o_g * jnp.tanh(c_new)
        return (h_new, c_new), h_new

    pf = (wih_f, whh_f, bih_f, bhh_f)
    pb = (wih_b, whh_b, bih_b, bhh_b)

    def bilstm(x, state):
        hf0, cf0, hb0, cb0 = state
        (hfT, cfT), hs_f = lax.scan(lambda c, xt: cell(pf, c, xt), (hf0, cf0), x)
        (hbT, cbT), hs_b_rev = lax.scan(lambda c, xt: cell(pb, c, xt), (hb0, cb0),
                                        x[::-1])
        out = jnp.concatenate([hs_f, hs_b_rev[::-1]], axis=-1)     # (T, B, 2H)
        return out, (hfT, cfT, hbT, cbT)

    z = jnp.zeros((B, H), jnp.float32)
    out1, hidden = bilstm(x1, (z, z, z, z))
    out2, _ = bilstm(x2, hidden)                                   # hidden carries over
    feat = jnp.concatenate([out1[-1], out2[-1]], axis=-1)          # (B, 4H)
    logits = feat @ w_label.T + b_label
    return jax.nn.log_softmax(logits, axis=-1)


if __name__ == "__main__":
    T, B, E, H = 8, 2, 32, 32          # seq_len, batch, embedding_dim, hidden_dim
    V, L = 100, 3                      # vocab_size, label_size

    key = jax.random.PRNGKey(0)
    ks = jax.random.split(key, 13)
    scale = 1.0 / jnp.sqrt(H)          # PyTorch default uniform(-1/sqrt(H), 1/sqrt(H))

    def u(k, shape):
        return jax.random.uniform(k, shape, jnp.float32, -scale, scale)

    emb_table = jax.random.normal(ks[0], (V, E), jnp.float32)
    wih_f = u(ks[1], (4 * H, E)); whh_f = u(ks[2], (4 * H, H))
    bih_f = u(ks[3], (4 * H,));   bhh_f = u(ks[4], (4 * H,))
    wih_b = u(ks[5], (4 * H, E)); whh_b = u(ks[6], (4 * H, H))
    bih_b = u(ks[7], (4 * H,));   bhh_b = u(ks[8], (4 * H,))
    w_label = u(ks[9], (L, 4 * H)); b_label = u(ks[10], (L,))
    sentence1 = jax.random.randint(ks[11], (T, B), 0, V, dtype=jnp.int32)
    sentence2 = jax.random.randint(ks[12], (T, B), 0, V, dtype=jnp.int32)

    # one-time parameter packing (outside the per-call path)
    wx, whh, b, wl, bl = prepare_bilstm_nli_params(
        wih_f, whh_f, bih_f, bhh_f, wih_b, whh_b, bih_b, bhh_b, w_label, b_label)

    fwd = jax.jit(bilstm_nli_forward, static_argnames=("label_size",))
    out = fwd(sentence1, sentence2, emb_table, wx, whh, b, wl, bl, label_size=L)
    out = jax.block_until_ready(out)

    ref = _reference(sentence1, sentence2, emb_table,
                     wih_f, whh_f, bih_f, bhh_f, wih_b, whh_b, bih_b, bhh_b,
                     w_label, b_label)
    assert out.shape == (B, L)
    assert jnp.allclose(out, ref, rtol=1e-3, atol=1e-3), "mismatch vs JAX reference"

    print("KERNEL_OK")
</pallas_src>

<mosaic_0001>
module attributes {stable_mosaic.version = 11 : i64} {
  func.func @_bilstm_nli_kernel(%arg0: memref<32x32xf32, #tpu.memory_space<vmem>>, %arg1: memref<32x256xf32, #tpu.memory_space<vmem>>, %arg2: memref<32x256xf32, #tpu.memory_space<vmem>>, %arg3: memref<1x256xf32, #tpu.memory_space<vmem>>, %arg4: memref<128x128xf32, #tpu.memory_space<vmem>>, %arg5: memref<1x128xf32, #tpu.memory_space<vmem>>, %arg6: memref<2x3xf32, #tpu.memory_space<vmem>>) attributes {dimension_semantics = [], scalar_prefetch = 0 : i64, scratch_operands = 0 : i64, tpu.core_type = #tpu.core_type<tc>} {
    %c0 = arith.constant 0 : index
    %c0_0 = arith.constant 0 : index
    %0 = vector.load %arg0[%c0, %c0_0] : memref<32x32xf32, #tpu.memory_space<vmem>>, vector<32x32xf32>
    %c0_1 = arith.constant 0 : index
    %c0_2 = arith.constant 0 : index
    %1 = vector.load %arg1[%c0_1, %c0_2] : memref<32x256xf32, #tpu.memory_space<vmem>>, vector<32x256xf32>
    %cst = arith.constant dense<0.000000e+00> : vector<32x256xf32>
    %2 = tpu.matmul %0, %1, %cst {dimension_numbers = #tpu.dot_dimension_numbers<[1], [0], [0], [1], [0, 0, 1, 1], [], []>} : vector<32x32xf32>, vector<32x256xf32>, vector<32x256xf32> -> vector<32x256xf32>
    %c0_3 = arith.constant 0 : index
    %c0_4 = arith.constant 0 : index
    %3 = vector.load %arg3[%c0_3, %c0_4] : memref<1x256xf32, #tpu.memory_space<vmem>>, vector<1x256xf32>
    %4 = vector.broadcast %3 : vector<1x256xf32> to vector<32x256xf32>
    %5 = arith.addf %2, %4 : vector<32x256xf32>
    %c0_5 = arith.constant 0 : index
    %c0_6 = arith.constant 0 : index
    %6 = vector.load %arg2[%c0_5, %c0_6] : memref<32x256xf32, #tpu.memory_space<vmem>>, vector<32x256xf32>
    %7 = vector.extract_strided_slice %6 {offsets = [0, 0], sizes = [32, 128], strides = [1, 1]} : vector<32x256xf32> to vector<32x128xf32>
    %8 = vector.extract_strided_slice %6 {offsets = [0, 128], sizes = [32, 128], strides = [1, 1]} : vector<32x256xf32> to vector<32x128xf32>
    %9 = vector.extract_strided_slice %5 {offsets = [0, 0], sizes = [2, 256], strides = [1, 1]} : vector<32x256xf32> to vector<2x256xf32>
    %10 = vector.extract_strided_slice %5 {offsets = [14, 0], sizes = [2, 256], strides = [1, 1]} : vector<32x256xf32> to vector<2x256xf32>
    %11 = tpu.concatenate %9, %10 in 0 : vector<2x256xf32>, vector<2x256xf32> -> vector<4x256xf32>
    %12 = vector.extract_strided_slice %5 {offsets = [2, 0], sizes = [2, 256], strides = [1, 1]} : vector<32x256xf32> to vector<2x256xf32>
    %13 = vector.extract_strided_slice %5 {offsets = [12, 0], sizes = [2, 256], strides = [1, 1]} : vector<32x256xf32> to vector<2x256xf32>
    %14 = tpu.concatenate %12, %13 in 0 : vector<2x256xf32>, vector<2x256xf32> -> vector<4x256xf32>
    %15 = vector.extract_strided_slice %5 {offsets = [4, 0], sizes = [2, 256], strides = [1, 1]} : vector<32x256xf32> to vector<2x256xf32>
    %16 = vector.extract_strided_slice %5 {offsets = [10, 0], sizes = [2, 256], strides = [1, 1]} : vector<32x256xf32> to vector<2x256xf32>
    %17 = tpu.concatenate %15, %16 in 0 : vector<2x256xf32>, vector<2x256xf32> -> vector<4x256xf32>
    %18 = vector.extract_strided_slice %5 {offsets = [6, 0], sizes = [2, 256], strides = [1, 1]} : vector<32x256xf32> to vector<2x256xf32>
    %19 = vector.extract_strided_slice %5 {offsets = [8, 0], sizes = [2, 256], strides = [1, 1]} : vector<32x256xf32> to vector<2x256xf32>
    %20 = tpu.concatenate %18, %19 in 0 : vector<2x256xf32>, vector<2x256xf32> -> vector<4x256xf32>
    %21 = vector.extract_strided_slice %5 {offsets = [8, 0], sizes = [2, 256], strides = [1, 1]} : vector<32x256xf32> to vector<2x256xf32>
    %22 = vector.extract_strided_slice %5 {offsets = [6, 0], sizes = [2, 256], strides = [1, 1]} : vector<32x256xf32> to vector<2x256xf32>
    %23 = tpu.concatenate %21, %22 in 0 : vector<2x256xf32>, vector<2x256xf32> -> vector<4x256xf32>
    %24 = vector.extract_strided_slice %5 {offsets = [10, 0], sizes = [2, 256], strides = [1, 1]} : vector<32x256xf32> to vector<2x256xf32>
    %25 = vector.extract_strided_slice %5 {offsets = [4, 0], sizes = [2, 256], strides = [1, 1]} : vector<32x256xf32> to vector<2x256xf32>
    %26 = tpu.concatenate %24, %25 in 0 : vector<2x256xf32>, vector<2x256xf32> -> vector<4x256xf32>
    %27 = vector.extract_strided_slice %5 {offsets = [12, 0], sizes = [2, 256], strides = [1, 1]} : vector<32x256xf32> to vector<2x256xf32>
    %28 = vector.extract_strided_slice %5 {offsets = [2, 0], sizes = [2, 256], strides = [1, 1]} : vector<32x256xf32> to vector<2x256xf32>
    %29 = tpu.concatenate %27, %28 in 0 : vector<2x256xf32>, vector<2x256xf32> -> vector<4x256xf32>
    %30 = vector.extract_strided_slice %5 {offsets = [14, 0], sizes = [2, 256], strides = [1, 1]} : vector<32x256xf32> to vector<2x256xf32>
    %31 = vector.extract_strided_slice %5 {offsets = [0, 0], sizes = [2, 256], strides = [1, 1]} : vector<32x256xf32> to vector<2x256xf32>
    %32 = tpu.concatenate %30, %31 in 0 : vector<2x256xf32>, vector<2x256xf32> -> vector<4x256xf32>
    %33 = vector.extract_strided_slice %5 {offsets = [16, 0], sizes = [2, 128], strides = [1, 1]} : vector<32x256xf32> to vector<2x128xf32>
    %34 = vector.extract_strided_slice %5 {offsets = [18, 0], sizes = [2, 128], strides = [1, 1]} : vector<32x256xf32> to vector<2x128xf32>
    %35 = vector.extract_strided_slice %5 {offsets = [20, 0], sizes = [2, 128], strides = [1, 1]} : vector<32x256xf32> to vector<2x128xf32>
    %36 = vector.extract_strided_slice %5 {offsets = [22, 0], sizes = [2, 128], strides = [1, 1]} : vector<32x256xf32> to vector<2x128xf32>
    %37 = vector.extract_strided_slice %5 {offsets = [24, 0], sizes = [2, 128], strides = [1, 1]} : vector<32x256xf32> to vector<2x128xf32>
    %38 = vector.extract_strided_slice %5 {offsets = [26, 0], sizes = [2, 128], strides = [1, 1]} : vector<32x256xf32> to vector<2x128xf32>
    %39 = vector.extract_strided_slice %5 {offsets = [28, 0], sizes = [2, 128], strides = [1, 1]} : vector<32x256xf32> to vector<2x128xf32>
    %40 = vector.extract_strided_slice %5 {offsets = [30, 0], sizes = [2, 128], strides = [1, 1]} : vector<32x256xf32> to vector<2x128xf32>
    %41 = vector.extract_strided_slice %5 {offsets = [30, 128], sizes = [2, 128], strides = [1, 1]} : vector<32x256xf32> to vector<2x128xf32>
    %cst_7 = arith.constant 0.000000e+00 : f32
    %42 = vector.broadcast %cst_7 : f32 to vector<2x32xf32>
    %43 = tpu.concatenate %42, %42 in 0 : vector<2x32xf32>, vector<2x32xf32> -> vector<4x32xf32>
    %cst_8 = arith.constant dense<0.000000e+00> : vector<4x256xf32>
    %44 = tpu.matmul %43, %6, %cst_8 {dimension_numbers = #tpu.dot_dimension_numbers<[1], [0], [0], [1], [0, 0, 1, 1], [], []>} : vector<4x32xf32>, vector<32x256xf32>, vector<4x256xf32> -> vector<4x256xf32>
    %45 = arith.addf %11, %44 : vector<4x256xf32>
    %46 = arith.negf %45 : vector<4x256xf32>
    %47 = math.exp %46 : vector<4x256xf32>
    %cst_9 = arith.constant 1.000000e+00 : f32
    %48 = vector.broadcast %cst_9 : f32 to vector<4x256xf32>
    %49 = arith.addf %48, %47 : vector<4x256xf32>
    %50 = arith.divf %48, %49 : vector<4x256xf32>
    %51 = math.tanh %45 : vector<4x256xf32>
    %52 = vector.extract_strided_slice %50 {offsets = [0, 0], sizes = [2, 128], strides = [1, 1]} : vector<4x256xf32> to vector<2x128xf32>
    %53 = vector.extract_strided_slice %51 {offsets = [0, 0], sizes = [2, 128], strides = [1, 1]} : vector<4x256xf32> to vector<2x128xf32>
    %54 = vector.extract_strided_slice %52 {offsets = [0, 32], sizes = [2, 32], strides = [1, 1]} : vector<2x128xf32> to vector<2x32xf32>
    %55 = arith.mulf %54, %42 : vector<2x32xf32>
    %56 = vector.extract_strided_slice %52 {offsets = [0, 0], sizes = [2, 32], strides = [1, 1]} : vector<2x128xf32> to vector<2x32xf32>
    %57 = vector.extract_strided_slice %53 {offsets = [0, 64], sizes = [2, 32], strides = [1, 1]} : vector<2x128xf32> to vector<2x32xf32>
    %58 = arith.mulf %56, %57 : vector<2x32xf32>
    %59 = arith.addf %55, %58 : vector<2x32xf32>
    %60 = vector.extract_strided_slice %52 {offsets = [0, 96], sizes = [2, 32], strides = [1, 1]} : vector<2x128xf32> to vector<2x32xf32>
    %61 = math.tanh %59 : vector<2x32xf32>
    %62 = arith.mulf %60, %61 : vector<2x32xf32>
    %63 = vector.extract_strided_slice %50 {offsets = [2, 128], sizes = [2, 128], strides = [1, 1]} : vector<4x256xf32> to vector<2x128xf32>
    %64 = vector.extract_strided_slice %51 {offsets = [2, 128], sizes = [2, 128], strides = [1, 1]} : vector<4x256xf32> to vector<2x128xf32>
    %65 = vector.extract_strided_slice %63 {offsets = [0, 32], sizes = [2, 32], strides = [1, 1]} : vector<2x128xf32> to vector<2x32xf32>
    %66 = arith.mulf %65, %42 : vector<2x32xf32>
    %67 = vector.extract_strided_slice %63 {offsets = [0, 0], sizes = [2, 32], strides = [1, 1]} : vector<2x128xf32> to vector<2x32xf32>
    %68 = vector.extract_strided_slice %64 {offsets = [0, 64], sizes = [2, 32], strides = [1, 1]} : vector<2x128xf32> to vector<2x32xf32>
    %69 = arith.mulf %67, %68 : vector<2x32xf32>
    %70 = arith.addf %66, %69 : vector<2x32xf32>
    %71 = vector.extract_strided_slice %63 {offsets = [0, 96], sizes = [2, 32], strides = [1, 1]} : vector<2x128xf32> to vector<2x32xf32>
    %72 = math.tanh %70 : vector<2x32xf32>
    %73 = arith.mulf %71, %72 : vector<2x32xf32>
    %74 = tpu.concatenate %62, %73 in 0 : vector<2x32xf32>, vector<2x32xf32> -> vector<4x32xf32>
    %cst_10 = arith.constant dense<0.000000e+00> : vector<4x256xf32>
    %75 = tpu.matmul %74, %6, %cst_10 {dimension_numbers = #tpu.dot_dimension_numbers<[1], [0], [0], [1], [0, 0, 1, 1], [], []>} : vector<4x32xf32>, vector<32x256xf32>, vector<4x256xf32> -> vector<4x256xf32>
    %76 = arith.addf %14, %75 : vector<4x256xf32>
    %77 = arith.negf %76 : vector<4x256xf32>
    %78 = math.exp %77 : vector<4x256xf32>
    %cst_11 = arith.constant 1.000000e+00 : f32
    %79 = vector.broadcast %cst_11 : f32 to vector<4x256xf32>
    %80 = arith.addf %79, %78 : vector<4x256xf32>
    %81 = arith.divf %79, %80 : vector<4x256xf32>
    %82 = math.tanh %76 : vector<4x256xf32>
    %83 = vector.extract_strided_slice %81 {offsets = [0, 0], sizes = [2, 128], strides = [1, 1]} : vector<4x256xf32> to vector<2x128xf32>
    %84 = vector.extract_strided_slice %82 {offsets = [0, 0], sizes = [2, 128], strides = [1, 1]} : vector<4x256xf32> to vector<2x128xf32>
    %85 = vector.extract_strided_slice %83 {offsets = [0, 32], sizes = [2, 32], strides = [1, 1]} : vector<2x128xf32> to vector<2x32xf32>
    %86 = arith.mulf %85, %59 : vector<2x32xf32>
    %87 = vector.extract_strided_slice %83 {offsets = [0, 0], sizes = [2, 32], strides = [1, 1]} : vector<2x128xf32> to vector<2x32xf32>
    %88 = vector.extract_strided_slice %84 {offsets = [0, 64], sizes = [2, 32], strides = [1, 1]} : vector<2x128xf32> to vector<2x32xf32>
    %89 = arith.mulf %87, %88 : vector<2x32xf32>
    %90 = arith.addf %86, %89 : vector<2x32xf32>
    %91 = vector.extract_strided_slice %83 {offsets = [0, 96], sizes = [2, 32], strides = [1, 1]} : vector<2x128xf32> to vector<2x32xf32>
    %92 = math.tanh %90 : vector<2x32xf32>
    %93 = arith.mulf %91, %92 : vector<2x32xf32>
    %94 = vector.extract_strided_slice %81 {offsets = [2, 128], sizes = [2, 128], strides = [1, 1]} : vector<4x256xf32> to vector<2x128xf32>
    %95 = vector.extract_strided_slice %82 {offsets = [2, 128], sizes = [2, 128], strides = [1, 1]} : vector<4x256xf32> to vector<2x128xf32>
    %96 = vector.extract_strided_slice %94 {offsets = [0, 32], sizes = [2, 32], strides = [1, 1]} : vector<2x128xf32> to vector<2x32xf32>
    %97 = arith.mulf %96, %70 : vector<2x32xf32>
    %98 = vector.extract_strided_slice %94 {offsets = [0, 0], sizes = [2, 32], strides = [1, 1]} : vector<2x128xf32> to vector<2x32xf32>
    %99 = vector.extract_strided_slice %95 {offsets = [0, 64], sizes = [2, 32], strides = [1, 1]} : vector<2x128xf32> to vector<2x32xf32>
    %100 = arith.mulf %98, %99 : vector<2x32xf32>
    %101 = arith.addf %97, %100 : vector<2x32xf32>
    %102 = vector.extract_strided_slice %94 {offsets = [0, 96], sizes = [2, 32], strides = [1, 1]} : vector<2x128xf32> to vector<2x32xf32>
    %103 = math.tanh %101 : vector<2x32xf32>
    %104 = arith.mulf %102, %103 : vector<2x32xf32>
    %105 = tpu.concatenate %93, %104 in 0 : vector<2x32xf32>, vector<2x32xf32> -> vector<4x32xf32>
    %cst_12 = arith.constant dense<0.000000e+00> : vector<4x256xf32>
    %106 = tpu.matmul %105, %6, %cst_12 {dimension_numbers = #tpu.dot_dimension_numbers<[1], [0], [0], [1], [0, 0, 1, 1], [], []>} : vector<4x32xf32>, vector<32x256xf32>, vector<4x256xf32> -> vector<4x256xf32>
    %107 = arith.addf %17, %106 : vector<4x256xf32>
    %108 = arith.negf %107 : vector<4x256xf32>
    %109 = math.exp %108 : vector<4x256xf32>
    %cst_13 = arith.constant 1.000000e+00 : f32
    %110 = vector.broadcast %cst_13 : f32 to vector<4x256xf32>
    %111 = arith.addf %110, %109 : vector<4x256xf32>
    %112 = arith.divf %110, %111 : vector<4x256xf32>
    %113 = math.tanh %107 : vector<4x256xf32>
    %114 = vector.extract_strided_slice %112 {offsets = [0, 0], sizes = [2, 128], strides = [1, 1]} : vector<4x256xf32> to vector<2x128xf32>
    %115 = vector.extract_strided_slice %113 {offsets = [0, 0], sizes = [2, 128], strides = [1, 1]} : vector<4x256xf32> to vector<2x128xf32>
    %116 = vector.extract_strided_slice %114 {offsets = [0, 32], sizes = [2, 32], strides = [1, 1]} : vector<2x128xf32> to vector<2x32xf32>
    %117 = arith.mulf %116, %90 : vector<2x32xf32>
    %118 = vector.extract_strided_slice %114 {offsets = [0, 0], sizes = [2, 32], strides = [1, 1]} : vector<2x128xf32> to vector<2x32xf32>
    %119 = vector.extract_strided_slice %115 {offsets = [0, 64], sizes = [2, 32], strides = [1, 1]} : vector<2x128xf32> to vector<2x32xf32>
    %120 = arith.mulf %118, %119 : vector<2x32xf32>
    %121 = arith.addf %117, %120 : vector<2x32xf32>
    %122 = vector.extract_strided_slice %114 {offsets = [0, 96], sizes = [2, 32], strides = [1, 1]} : vector<2x128xf32> to vector<2x32xf32>
    %123 = math.tanh %121 : vector<2x32xf32>
    %124 = arith.mulf %122, %123 : vector<2x32xf32>
    %125 = vector.extract_strided_slice %112 {offsets = [2, 128], sizes = [2, 128], strides = [1, 1]} : vector<4x256xf32> to vector<2x128xf32>
    %126 = vector.extract_strided_slice %113 {offsets = [2, 128], sizes = [2, 128], strides = [1, 1]} : vector<4x256xf32> to vector<2x128xf32>
    %127 = vector.extract_strided_slice %125 {offsets = [0, 32], sizes = [2, 32], strides = [1, 1]} : vector<2x128xf32> to vector<2x32xf32>
    %128 = arith.mulf %127, %101 : vector<2x32xf32>
    %129 = vector.extract_strided_slice %125 {offsets = [0, 0], sizes = [2, 32], strides = [1, 1]} : vector<2x128xf32> to vector<2x32xf32>
    %130 = vector.extract_strided_slice %126 {offsets = [0, 64], sizes = [2, 32], strides = [1, 1]} : vector<2x128xf32> to vector<2x32xf32>
    %131 = arith.mulf %129, %130 : vector<2x32xf32>
    %132 = arith.addf %128, %131 : vector<2x32xf32>
    %133 = vector.extract_strided_slice %125 {offsets = [0, 96], sizes = [2, 32], strides = [1, 1]} : vector<2x128xf32> to vector<2x32xf32>
    %134 = math.tanh %132 : vector<2x32xf32>
    %135 = arith.mulf %133, %134 : vector<2x32xf32>
    %136 = tpu.concatenate %124, %135 in 0 : vector<2x32xf32>, vector<2x32xf32> -> vector<4x32xf32>
    %cst_14 = arith.constant dense<0.000000e+00> : vector<4x256xf32>
    %137 = tpu.matmul %136, %6, %cst_14 {dimension_numbers = #tpu.dot_dimension_numbers<[1], [0], [0], [1], [0, 0, 1, 1], [], []>} : vector<4x32xf32>, vector<32x256xf32>, vector<4x256xf32> -> vector<4x256xf32>
    %138 = arith.addf %20, %137 : vector<4x256xf32>
    %139 = arith.negf %138 : vector<4x256xf32>
    %140 = math.exp %139 : vector<4x256xf32>
    %cst_15 = arith.constant 1.000000e+00 : f32
    %141 = vector.broadcast %cst_15 : f32 to vector<4x256xf32>
    %142 = arith.addf %141, %140 : vector<4x256xf32>
    %143 = arith.divf %141, %142 : vector<4x256xf32>
    %144 = math.tanh %138 : vector<4x256xf32>
    %145 = vector.extract_strided_slice %143 {offsets = [0, 0], sizes = [2, 128], strides = [1, 1]} : vector<4x256xf32> to vector<2x128xf32>
    %146 = vector.extract_strided_slice %144 {offsets = [0, 0], sizes = [2, 128], strides = [1, 1]} : vector<4x256xf32> to vector<2x128xf32>
    %147 = vector.extract_strided_slice %145 {offsets = [0, 32], sizes = [2, 32], strides = [1, 1]} : vector<2x128xf32> to vector<2x32xf32>
    %148 = arith.mulf %147, %121 : vector<2x32xf32>
    %149 = vector.extract_strided_slice %145 {offsets = [0, 0], sizes = [2, 32], strides = [1, 1]} : vector<2x128xf32> to vector<2x32xf32>
    %150 = vector.extract_strided_slice %146 {offsets = [0, 64], sizes = [2, 32], strides = [1, 1]} : vector<2x128xf32> to vector<2x32xf32>
    %151 = arith.mulf %149, %150 : vector<2x32xf32>
    %152 = arith.addf %148, %151 : vector<2x32xf32>
    %153 = vector.extract_strided_slice %145 {offsets = [0, 96], sizes = [2, 32], strides = [1, 1]} : vector<2x128xf32> to vector<2x32xf32>
    %154 = math.tanh %152 : vector<2x32xf32>
    %155 = arith.mulf %153, %154 : vector<2x32xf32>
    %156 = vector.extract_strided_slice %143 {offsets = [2, 128], sizes = [2, 128], strides = [1, 1]} : vector<4x256xf32> to vector<2x128xf32>
    %157 = vector.extract_strided_slice %144 {offsets = [2, 128], sizes = [2, 128], strides = [1, 1]} : vector<4x256xf32> to vector<2x128xf32>
    %158 = vector.extract_strided_slice %156 {offsets = [0, 32], sizes = [2, 32], strides = [1, 1]} : vector<2x128xf32> to vector<2x32xf32>
    %159 = arith.mulf %158, %132 : vector<2x32xf32>
    %160 = vector.extract_strided_slice %156 {offsets = [0, 0], sizes = [2, 32], strides = [1, 1]} : vector<2x128xf32> to vector<2x32xf32>
    %161 = vector.extract_strided_slice %157 {offsets = [0, 64], sizes = [2, 32], strides = [1, 1]} : vector<2x128xf32> to vector<2x32xf32>
    %162 = arith.mulf %160, %161 : vector<2x32xf32>
    %163 = arith.addf %159, %162 : vector<2x32xf32>
    %164 = vector.extract_strided_slice %156 {offsets = [0, 96], sizes = [2, 32], strides = [1, 1]} : vector<2x128xf32> to vector<2x32xf32>
    %165 = math.tanh %163 : vector<2x32xf32>
    %166 = arith.mulf %164, %165 : vector<2x32xf32>
    %167 = tpu.concatenate %155, %166 in 0 : vector<2x32xf32>, vector<2x32xf32> -> vector<4x32xf32>
    %cst_16 = arith.constant dense<0.000000e+00> : vector<4x256xf32>
    %168 = tpu.matmul %167, %6, %cst_16 {dimension_numbers = #tpu.dot_dimension_numbers<[1], [0], [0], [1], [0, 0, 1, 1], [], []>} : vector<4x32xf32>, vector<32x256xf32>, vector<4x256xf32> -> vector<4x256xf32>
    %169 = arith.addf %23, %168 : vector<4x256xf32>
    %170 = arith.negf %169 : vector<4x256xf32>
    %171 = math.exp %170 : vector<4x256xf32>
    %cst_17 = arith.constant 1.000000e+00 : f32
    %172 = vector.broadcast %cst_17 : f32 to vector<4x256xf32>
    %173 = arith.addf %172, %171 : vector<4x256xf32>
    %174 = arith.divf %172, %173 : vector<4x256xf32>
    %175 = math.tanh %169 : vector<4x256xf32>
    %176 = vector.extract_strided_slice %174 {offsets = [0, 0], sizes = [2, 128], strides = [1, 1]} : vector<4x256xf32> to vector<2x128xf32>
    %177 = vector.extract_strided_slice %175 {offsets = [0, 0], sizes = [2, 128], strides = [1, 1]} : vector<4x256xf32> to vector<2x128xf32>
    %178 = vector.extract_strided_slice %176 {offsets = [0, 32], sizes = [2, 32], strides = [1, 1]} : vector<2x128xf32> to vector<2x32xf32>
    %179 = arith.mulf %178, %152 : vector<2x32xf32>
    %180 = vector.extract_strided_slice %176 {offsets = [0, 0], sizes = [2, 32], strides = [1, 1]} : vector<2x128xf32> to vector<2x32xf32>
    %181 = vector.extract_strided_slice %177 {offsets = [0, 64], sizes = [2, 32], strides = [1, 1]} : vector<2x128xf32> to vector<2x32xf32>
    %182 = arith.mulf %180, %181 : vector<2x32xf32>
    %183 = arith.addf %179, %182 : vector<2x32xf32>
    %184 = vector.extract_strided_slice %176 {offsets = [0, 96], sizes = [2, 32], strides = [1, 1]} : vector<2x128xf32> to vector<2x32xf32>
    %185 = math.tanh %183 : vector<2x32xf32>
    %186 = arith.mulf %184, %185 : vector<2x32xf32>
    %187 = vector.extract_strided_slice %174 {offsets = [2, 128], sizes = [2, 128], strides = [1, 1]} : vector<4x256xf32> to vector<2x128xf32>
    %188 = vector.extract_strided_slice %175 {offsets = [2, 128], sizes = [2, 128], strides = [1, 1]} : vector<4x256xf32> to vector<2x128xf32>
    %189 = vector.extract_strided_slice %187 {offsets = [0, 32], sizes = [2, 32], strides = [1, 1]} : vector<2x128xf32> to vector<2x32xf32>
    %190 = arith.mulf %189, %163 : vector<2x32xf32>
    %191 = vector.extract_strided_slice %187 {offsets = [0, 0], sizes = [2, 32], strides = [1, 1]} : vector<2x128xf32> to vector<2x32xf32>
    %192 = vector.extract_strided_slice %188 {offsets = [0, 64], sizes = [2, 32], strides = [1, 1]} : vector<2x128xf32> to vector<2x32xf32>
    %193 = arith.mulf %191, %192 : vector<2x32xf32>
    %194 = arith.addf %190, %193 : vector<2x32xf32>
    %195 = vector.extract_strided_slice %187 {offsets = [0, 96], sizes = [2, 32], strides = [1, 1]} : vector<2x128xf32> to vector<2x32xf32>
    %196 = math.tanh %194 : vector<2x32xf32>
    %197 = arith.mulf %195, %196 : vector<2x32xf32>
    %198 = tpu.concatenate %186, %197 in 0 : vector<2x32xf32>, vector<2x32xf32> -> vector<4x32xf32>
    %cst_18 = arith.constant dense<0.000000e+00> : vector<4x256xf32>
    %199 = tpu.matmul %198, %6, %cst_18 {dimension_numbers = #tpu.dot_dimension_numbers<[1], [0], [0], [1], [0, 0, 1, 1], [], []>} : vector<4x32xf32>, vector<32x256xf32>, vector<4x256xf32> -> vector<4x256xf32>
    %200 = arith.addf %26, %199 : vector<4x256xf32>
    %201 = arith.negf %200 : vector<4x256xf32>
    %202 = math.exp %201 : vector<4x256xf32>
    %cst_19 = arith.constant 1.000000e+00 : f32
    %203 = vector.broadcast %cst_19 : f32 to vector<4x256xf32>
    %204 = arith.addf %203, %202 : vector<4x256xf32>
    %205 = arith.divf %203, %204 : vector<4x256xf32>
    %206 = math.tanh %200 : vector<4x256xf32>
    %207 = vector.extract_strided_slice %205 {offsets = [0, 0], sizes = [2, 128], strides = [1, 1]} : vector<4x256xf32> to vector<2x128xf32>
    %208 = vector.extract_strided_slice %206 {offsets = [0, 0], sizes = [2, 128], strides = [1, 1]} : vector<4x256xf32> to vector<2x128xf32>
    %209 = vector.extract_strided_slice %207 {offsets = [0, 32], sizes = [2, 32], strides = [1, 1]} : vector<2x128xf32> to vector<2x32xf32>
    %210 = arith.mulf %209, %183 : vector<2x32xf32>
    %211 = vector.extract_strided_slice %207 {offsets = [0, 0], sizes = [2, 32], strides = [1, 1]} : vector<2x128xf32> to vector<2x32xf32>
    %212 = vector.extract_strided_slice %208 {offsets = [0, 64], sizes = [2, 32], strides = [1, 1]} : vector<2x128xf32> to vector<2x32xf32>
    %213 = arith.mulf %211, %212 : vector<2x32xf32>
    %214 = arith.addf %210, %213 : vector<2x32xf32>
    %215 = vector.extract_strided_slice %207 {offsets = [0, 96], sizes = [2, 32], strides = [1, 1]} : vector<2x128xf32> to vector<2x32xf32>
    %216 = math.tanh %214 : vector<2x32xf32>
    %217 = arith.mulf %215, %216 : vector<2x32xf32>
    %218 = vector.extract_strided_slice %205 {offsets = [2, 128], sizes = [2, 128], strides = [1, 1]} : vector<4x256xf32> to vector<2x128xf32>
    %219 = vector.extract_strided_slice %206 {offsets = [2, 128], sizes = [2, 128], strides = [1, 1]} : vector<4x256xf32> to vector<2x128xf32>
    %220 = vector.extract_strided_slice %218 {offsets = [0, 32], sizes = [2, 32], strides = [1, 1]} : vector<2x128xf32> to vector<2x32xf32>
    %221 = arith.mulf %220, %194 : vector<2x32xf32>
    %222 = vector.extract_strided_slice %218 {offsets = [0, 0], sizes = [2, 32], strides = [1, 1]} : vector<2x128xf32> to vector<2x32xf32>
    %223 = vector.extract_strided_slice %219 {offsets = [0, 64], sizes = [2, 32], strides = [1, 1]} : vector<2x128xf32> to vector<2x32xf32>
    %224 = arith.mulf %222, %223 : vector<2x32xf32>
    %225 = arith.addf %221, %224 : vector<2x32xf32>
    %226 = vector.extract_strided_slice %218 {offsets = [0, 96], sizes = [2, 32], strides = [1, 1]} : vector<2x128xf32> to vector<2x32xf32>
    %227 = math.tanh %225 : vector<2x32xf32>
    %228 = arith.mulf %226, %227 : vector<2x32xf32>
    %229 = tpu.concatenate %217, %228 in 0 : vector<2x32xf32>, vector<2x32xf32> -> vector<4x32xf32>
    %cst_20 = arith.constant dense<0.000000e+00> : vector<4x256xf32>
    %230 = tpu.matmul %229, %6, %cst_20 {dimension_numbers = #tpu.dot_dimension_numbers<[1], [0], [0], [1], [0, 0, 1, 1], [], []>} : vector<4x32xf32>, vector<32x256xf32>, vector<4x256xf32> -> vector<4x256xf32>
    %231 = arith.addf %29, %230 : vector<4x256xf32>
    %232 = arith.negf %231 : vector<4x256xf32>
    %233 = math.exp %232 : vector<4x256xf32>
    %cst_21 = arith.constant 1.000000e+00 : f32
    %234 = vector.broadcast %cst_21 : f32 to vector<4x256xf32>
    %235 = arith.addf %234, %233 : vector<4x256xf32>
    %236 = arith.divf %234, %235 : vector<4x256xf32>
    %237 = math.tanh %231 : vector<4x256xf32>
    %238 = vector.extract_strided_slice %236 {offsets = [0, 0], sizes = [2, 128], strides = [1, 1]} : vector<4x256xf32> to vector<2x128xf32>
    %239 = vector.extract_strided_slice %237 {offsets = [0, 0], sizes = [2, 128], strides = [1, 1]} : vector<4x256xf32> to vector<2x128xf32>
    %240 = vector.extract_strided_slice %238 {offsets = [0, 32], sizes = [2, 32], strides = [1, 1]} : vector<2x128xf32> to vector<2x32xf32>
    %241 = arith.mulf %240, %214 : vector<2x32xf32>
    %242 = vector.extract_strided_slice %238 {offsets = [0, 0], sizes = [2, 32], strides = [1, 1]} : vector<2x128xf32> to vector<2x32xf32>
    %243 = vector.extract_strided_slice %239 {offsets = [0, 64], sizes = [2, 32], strides = [1, 1]} : vector<2x128xf32> to vector<2x32xf32>
    %244 = arith.mulf %242, %243 : vector<2x32xf32>
    %245 = arith.addf %241, %244 : vector<2x32xf32>
    %246 = vector.extract_strided_slice %238 {offsets = [0, 96], sizes = [2, 32], strides = [1, 1]} : vector<2x128xf32> to vector<2x32xf32>
    %247 = math.tanh %245 : vector<2x32xf32>
    %248 = arith.mulf %246, %247 : vector<2x32xf32>
    %249 = vector.extract_strided_slice %236 {offsets = [2, 128], sizes = [2, 128], strides = [1, 1]} : vector<4x256xf32> to vector<2x128xf32>
    %250 = vector.extract_strided_slice %237 {offsets = [2, 128], sizes = [2, 128], strides = [1, 1]} : vector<4x256xf32> to vector<2x128xf32>
    %251 = vector.extract_strided_slice %249 {offsets = [0, 32], sizes = [2, 32], strides = [1, 1]} : vector<2x128xf32> to vector<2x32xf32>
    %252 = arith.mulf %251, %225 : vector<2x32xf32>
    %253 = vector.extract_strided_slice %249 {offsets = [0, 0], sizes = [2, 32], strides = [1, 1]} : vector<2x128xf32> to vector<2x32xf32>
    %254 = vector.extract_strided_slice %250 {offsets = [0, 64], sizes = [2, 32], strides = [1, 1]} : vector<2x128xf32> to vector<2x32xf32>
    %255 = arith.mulf %253, %254 : vector<2x32xf32>
    %256 = arith.addf %252, %255 : vector<2x32xf32>
    %257 = vector.extract_strided_slice %249 {offsets = [0, 96], sizes = [2, 32], strides = [1, 1]} : vector<2x128xf32> to vector<2x32xf32>
    %258 = math.tanh %256 : vector<2x32xf32>
    %259 = arith.mulf %257, %258 : vector<2x32xf32>
    %260 = tpu.concatenate %248, %259 in 0 : vector<2x32xf32>, vector<2x32xf32> -> vector<4x32xf32>
    %cst_22 = arith.constant dense<0.000000e+00> : vector<4x256xf32>
    %261 = tpu.matmul %260, %6, %cst_22 {dimension_numbers = #tpu.dot_dimension_numbers<[1], [0], [0], [1], [0, 0, 1, 1], [], []>} : vector<4x32xf32>, vector<32x256xf32>, vector<4x256xf32> -> vector<4x256xf32>
    %262 = arith.addf %32, %261 : vector<4x256xf32>
    %263 = arith.negf %262 : vector<4x256xf32>
    %264 = math.exp %263 : vector<4x256xf32>
    %cst_23 = arith.constant 1.000000e+00 : f32
    %265 = vector.broadcast %cst_23 : f32 to vector<4x256xf32>
    %266 = arith.addf %265, %264 : vector<4x256xf32>
    %267 = arith.divf %265, %266 : vector<4x256xf32>
    %268 = math.tanh %262 : vector<4x256xf32>
    %269 = vector.extract_strided_slice %267 {offsets = [0, 0], sizes = [2, 128], strides = [1, 1]} : vector<4x256xf32> to vector<2x128xf32>
    %270 = vector.extract_strided_slice %268 {offsets = [0, 0], sizes = [2, 128], strides = [1, 1]} : vector<4x256xf32> to vector<2x128xf32>
    %271 = vector.extract_strided_slice %269 {offsets = [0, 32], sizes = [2, 32], strides = [1, 1]} : vector<2x128xf32> to vector<2x32xf32>
    %272 = arith.mulf %271, %245 : vector<2x32xf32>
    %273 = vector.extract_strided_slice %269 {offsets = [0, 0], sizes = [2, 32], strides = [1, 1]} : vector<2x128xf32> to vector<2x32xf32>
    %274 = vector.extract_strided_slice %270 {offsets = [0, 64], sizes = [2, 32], strides = [1, 1]} : vector<2x128xf32> to vector<2x32xf32>
    %275 = arith.mulf %273, %274 : vector<2x32xf32>
    %276 = arith.addf %272, %275 : vector<2x32xf32>
    %277 = vector.extract_strided_slice %269 {offsets = [0, 96], sizes = [2, 32], strides = [1, 1]} : vector<2x128xf32> to vector<2x32xf32>
    %278 = math.tanh %276 : vector<2x32xf32>
    %279 = arith.mulf %277, %278 : vector<2x32xf32>
    %280 = vector.extract_strided_slice %267 {offsets = [2, 128], sizes = [2, 128], strides = [1, 1]} : vector<4x256xf32> to vector<2x128xf32>
    %281 = vector.extract_strided_slice %268 {offsets = [2, 128], sizes = [2, 128], strides = [1, 1]} : vector<4x256xf32> to vector<2x128xf32>
    %282 = vector.extract_strided_slice %280 {offsets = [0, 32], sizes = [2, 32], strides = [1, 1]} : vector<2x128xf32> to vector<2x32xf32>
    %283 = arith.mulf %282, %256 : vector<2x32xf32>
    %284 = vector.extract_strided_slice %280 {offsets = [0, 0], sizes = [2, 32], strides = [1, 1]} : vector<2x128xf32> to vector<2x32xf32>
    %285 = vector.extract_strided_slice %281 {offsets = [0, 64], sizes = [2, 32], strides = [1, 1]} : vector<2x128xf32> to vector<2x32xf32>
    %286 = arith.mulf %284, %285 : vector<2x32xf32>
    %287 = arith.addf %283, %286 : vector<2x32xf32>
    %288 = vector.extract_strided_slice %280 {offsets = [0, 96], sizes = [2, 32], strides = [1, 1]} : vector<2x128xf32> to vector<2x32xf32>
    %289 = math.tanh %287 : vector<2x32xf32>
    %290 = arith.mulf %288, %289 : vector<2x32xf32>
    %cst_24 = arith.constant dense<0.000000e+00> : vector<2x128xf32>
    %291 = tpu.matmul %279, %7, %cst_24 {dimension_numbers = #tpu.dot_dimension_numbers<[1], [0], [0], [1], [0, 0, 1, 1], [], []>} : vector<2x32xf32>, vector<32x128xf32>, vector<2x128xf32> -> vector<2x128xf32>
    %292 = arith.addf %33, %291 : vector<2x128xf32>
    %293 = arith.negf %292 : vector<2x128xf32>
    %294 = math.exp %293 : vector<2x128xf32>
    %cst_25 = arith.constant 1.000000e+00 : f32
    %295 = vector.broadcast %cst_25 : f32 to vector<2x128xf32>
    %296 = arith.addf %295, %294 : vector<2x128xf32>
    %297 = arith.divf %295, %296 : vector<2x128xf32>
    %298 = math.tanh %292 : vector<2x128xf32>
    %299 = vector.extract_strided_slice %297 {offsets = [0, 32], sizes = [2, 32], strides = [1, 1]} : vector<2x128xf32> to vector<2x32xf32>
    %300 = arith.mulf %299, %276 : vector<2x32xf32>
    %301 = vector.extract_strided_slice %297 {offsets = [0, 0], sizes = [2, 32], strides = [1, 1]} : vector<2x128xf32> to vector<2x32xf32>
    %302 = vector.extract_strided_slice %298 {offsets = [0, 64], sizes = [2, 32], strides = [1, 1]} : vector<2x128xf32> to vector<2x32xf32>
    %303 = arith.mulf %301, %302 : vector<2x32xf32>
    %304 = arith.addf %300, %303 : vector<2x32xf32>
    %305 = vector.extract_strided_slice %297 {offsets = [0, 96], sizes = [2, 32], strides = [1, 1]} : vector<2x128xf32> to vector<2x32xf32>
    %306 = math.tanh %304 : vector<2x32xf32>
    %307 = arith.mulf %305, %306 : vector<2x32xf32>
    %cst_26 = arith.constant dense<0.000000e+00> : vector<2x128xf32>
    %308 = tpu.matmul %307, %7, %cst_26 {dimension_numbers = #tpu.dot_dimension_numbers<[1], [0], [0], [1], [0, 0, 1, 1], [], []>} : vector<2x32xf32>, vector<32x128xf32>, vector<2x128xf32> -> vector<2x128xf32>
    %309 = arith.addf %34, %308 : vector<2x128xf32>
    %310 = arith.negf %309 : vector<2x128xf32>
    %311 = math.exp %310 : vector<2x128xf32>
    %cst_27 = arith.constant 1.000000e+00 : f32
    %312 = vector.broadcast %cst_27 : f32 to vector<2x128xf32>
    %313 = arith.addf %312, %311 : vector<2x128xf32>
    %314 = arith.divf %312, %313 : vector<2x128xf32>
    %315 = math.tanh %309 : vector<2x128xf32>
    %316 = vector.extract_strided_slice %314 {offsets = [0, 32], sizes = [2, 32], strides = [1, 1]} : vector<2x128xf32> to vector<2x32xf32>
    %317 = arith.mulf %316, %304 : vector<2x32xf32>
    %318 = vector.extract_strided_slice %314 {offsets = [0, 0], sizes = [2, 32], strides = [1, 1]} : vector<2x128xf32> to vector<2x32xf32>
    %319 = vector.extract_strided_slice %315 {offsets = [0, 64], sizes = [2, 32], strides = [1, 1]} : vector<2x128xf32> to vector<2x32xf32>
    %320 = arith.mulf %318, %319 : vector<2x32xf32>
    %321 = arith.addf %317, %320 : vector<2x32xf32>
    %322 = vector.extract_strided_slice %314 {offsets = [0, 96], sizes = [2, 32], strides = [1, 1]} : vector<2x128xf32> to vector<2x32xf32>
    %323 = math.tanh %321 : vector<2x32xf32>
    %324 = arith.mulf %322, %323 : vector<2x32xf32>
    %cst_28 = arith.constant dense<0.000000e+00> : vector<2x128xf32>
    %325 = tpu.matmul %324, %7, %cst_28 {dimension_numbers = #tpu.dot_dimension_numbers<[1], [0], [0], [1], [0, 0, 1, 1], [], []>} : vector<2x32xf32>, vector<32x128xf32>, vector<2x128xf32> -> vector<2x128xf32>
    %326 = arith.addf %35, %325 : vector<2x128xf32>
    %327 = arith.negf %326 : vector<2x128xf32>
    %328 = math.exp %327 : vector<2x128xf32>
    %cst_29 = arith.constant 1.000000e+00 : f32
    %329 = vector.broadcast %cst_29 : f32 to vector<2x128xf32>
    %330 = arith.addf %329, %328 : vector<2x128xf32>
    %331 = arith.divf %329, %330 : vector<2x128xf32>
    %332 = math.tanh %326 : vector<2x128xf32>
    %333 = vector.extract_strided_slice %331 {offsets = [0, 32], sizes = [2, 32], strides = [1, 1]} : vector<2x128xf32> to vector<2x32xf32>
    %334 = arith.mulf %333, %321 : vector<2x32xf32>
    %335 = vector.extract_strided_slice %331 {offsets = [0, 0], sizes = [2, 32], strides = [1, 1]} : vector<2x128xf32> to vector<2x32xf32>
    %336 = vector.extract_strided_slice %332 {offsets = [0, 64], sizes = [2, 32], strides = [1, 1]} : vector<2x128xf32> to vector<2x32xf32>
    %337 = arith.mulf %335, %336 : vector<2x32xf32>
    %338 = arith.addf %334, %337 : vector<2x32xf32>
    %339 = vector.extract_strided_slice %331 {offsets = [0, 96], sizes = [2, 32], strides = [1, 1]} : vector<2x128xf32> to vector<2x32xf32>
    %340 = math.tanh %338 : vector<2x32xf32>
    %341 = arith.mulf %339, %340 : vector<2x32xf32>
    %cst_30 = arith.constant dense<0.000000e+00> : vector<2x128xf32>
    %342 = tpu.matmul %341, %7, %cst_30 {dimension_numbers = #tpu.dot_dimension_numbers<[1], [0], [0], [1], [0, 0, 1, 1], [], []>} : vector<2x32xf32>, vector<32x128xf32>, vector<2x128xf32> -> vector<2x128xf32>
    %343 = arith.addf %36, %342 : vector<2x128xf32>
    %344 = arith.negf %343 : vector<2x128xf32>
    %345 = math.exp %344 : vector<2x128xf32>
    %cst_31 = arith.constant 1.000000e+00 : f32
    %346 = vector.broadcast %cst_31 : f32 to vector<2x128xf32>
    %347 = arith.addf %346, %345 : vector<2x128xf32>
    %348 = arith.divf %346, %347 : vector<2x128xf32>
    %349 = math.tanh %343 : vector<2x128xf32>
    %350 = vector.extract_strided_slice %348 {offsets = [0, 32], sizes = [2, 32], strides = [1, 1]} : vector<2x128xf32> to vector<2x32xf32>
    %351 = arith.mulf %350, %338 : vector<2x32xf32>
    %352 = vector.extract_strided_slice %348 {offsets = [0, 0], sizes = [2, 32], strides = [1, 1]} : vector<2x128xf32> to vector<2x32xf32>
    %353 = vector.extract_strided_slice %349 {offsets = [0, 64], sizes = [2, 32], strides = [1, 1]} : vector<2x128xf32> to vector<2x32xf32>
    %354 = arith.mulf %352, %353 : vector<2x32xf32>
    %355 = arith.addf %351, %354 : vector<2x32xf32>
    %356 = vector.extract_strided_slice %348 {offsets = [0, 96], sizes = [2, 32], strides = [1, 1]} : vector<2x128xf32> to vector<2x32xf32>
    %357 = math.tanh %355 : vector<2x32xf32>
    %358 = arith.mulf %356, %357 : vector<2x32xf32>
    %cst_32 = arith.constant dense<0.000000e+00> : vector<2x128xf32>
    %359 = tpu.matmul %358, %7, %cst_32 {dimension_numbers = #tpu.dot_dimension_numbers<[1], [0], [0], [1], [0, 0, 1, 1], [], []>} : vector<2x32xf32>, vector<32x128xf32>, vector<2x128xf32> -> vector<2x128xf32>
    %360 = arith.addf %37, %359 : vector<2x128xf32>
    %361 = arith.negf %360 : vector<2x128xf32>
    %362 = math.exp %361 : vector<2x128xf32>
    %cst_33 = arith.constant 1.000000e+00 : f32
    %363 = vector.broadcast %cst_33 : f32 to vector<2x128xf32>
    %364 = arith.addf %363, %362 : vector<2x128xf32>
    %365 = arith.divf %363, %364 : vector<2x128xf32>
    %366 = math.tanh %360 : vector<2x128xf32>
    %367 = vector.extract_strided_slice %365 {offsets = [0, 32], sizes = [2, 32], strides = [1, 1]} : vector<2x128xf32> to vector<2x32xf32>
    %368 = arith.mulf %367, %355 : vector<2x32xf32>
    %369 = vector.extract_strided_slice %365 {offsets = [0, 0], sizes = [2, 32], strides = [1, 1]} : vector<2x128xf32> to vector<2x32xf32>
    %370 = vector.extract_strided_slice %366 {offsets = [0, 64], sizes = [2, 32], strides = [1, 1]} : vector<2x128xf32> to vector<2x32xf32>
    %371 = arith.mulf %369, %370 : vector<2x32xf32>
    %372 = arith.addf %368, %371 : vector<2x32xf32>
    %373 = vector.extract_strided_slice %365 {offsets = [0, 96], sizes = [2, 32], strides = [1, 1]} : vector<2x128xf32> to vector<2x32xf32>
    %374 = math.tanh %372 : vector<2x32xf32>
    %375 = arith.mulf %373, %374 : vector<2x32xf32>
    %cst_34 = arith.constant dense<0.000000e+00> : vector<2x128xf32>
    %376 = tpu.matmul %375, %7, %cst_34 {dimension_numbers = #tpu.dot_dimension_numbers<[1], [0], [0], [1], [0, 0, 1, 1], [], []>} : vector<2x32xf32>, vector<32x128xf32>, vector<2x128xf32> -> vector<2x128xf32>
    %377 = arith.addf %38, %376 : vector<2x128xf32>
    %378 = arith.negf %377 : vector<2x128xf32>
    %379 = math.exp %378 : vector<2x128xf32>
    %cst_35 = arith.constant 1.000000e+00 : f32
    %380 = vector.broadcast %cst_35 : f32 to vector<2x128xf32>
    %381 = arith.addf %380, %379 : vector<2x128xf32>
    %382 = arith.divf %380, %381 : vector<2x128xf32>
    %383 = math.tanh %377 : vector<2x128xf32>
    %384 = vector.extract_strided_slice %382 {offsets = [0, 32], sizes = [2, 32], strides = [1, 1]} : vector<2x128xf32> to vector<2x32xf32>
    %385 = arith.mulf %384, %372 : vector<2x32xf32>
    %386 = vector.extract_strided_slice %382 {offsets = [0, 0], sizes = [2, 32], strides = [1, 1]} : vector<2x128xf32> to vector<2x32xf32>
    %387 = vector.extract_strided_slice %383 {offsets = [0, 64], sizes = [2, 32], strides = [1, 1]} : vector<2x128xf32> to vector<2x32xf32>
    %388 = arith.mulf %386, %387 : vector<2x32xf32>
    %389 = arith.addf %385, %388 : vector<2x32xf32>
    %390 = vector.extract_strided_slice %382 {offsets = [0, 96], sizes = [2, 32], strides = [1, 1]} : vector<2x128xf32> to vector<2x32xf32>
    %391 = math.tanh %389 : vector<2x32xf32>
    %392 = arith.mulf %390, %391 : vector<2x32xf32>
    %cst_36 = arith.constant dense<0.000000e+00> : vector<2x128xf32>
    %393 = tpu.matmul %392, %7, %cst_36 {dimension_numbers = #tpu.dot_dimension_numbers<[1], [0], [0], [1], [0, 0, 1, 1], [], []>} : vector<2x32xf32>, vector<32x128xf32>, vector<2x128xf32> -> vector<2x128xf32>
    %394 = arith.addf %39, %393 : vector<2x128xf32>
    %395 = arith.negf %394 : vector<2x128xf32>
    %396 = math.exp %395 : vector<2x128xf32>
    %cst_37 = arith.constant 1.000000e+00 : f32
    %397 = vector.broadcast %cst_37 : f32 to vector<2x128xf32>
    %398 = arith.addf %397, %396 : vector<2x128xf32>
    %399 = arith.divf %397, %398 : vector<2x128xf32>
    %400 = math.tanh %394 : vector<2x128xf32>
    %401 = vector.extract_strided_slice %399 {offsets = [0, 32], sizes = [2, 32], strides = [1, 1]} : vector<2x128xf32> to vector<2x32xf32>
    %402 = arith.mulf %401, %389 : vector<2x32xf32>
    %403 = vector.extract_strided_slice %399 {offsets = [0, 0], sizes = [2, 32], strides = [1, 1]} : vector<2x128xf32> to vector<2x32xf32>
    %404 = vector.extract_strided_slice %400 {offsets = [0, 64], sizes = [2, 32], strides = [1, 1]} : vector<2x128xf32> to vector<2x32xf32>
    %405 = arith.mulf %403, %404 : vector<2x32xf32>
    %406 = arith.addf %402, %405 : vector<2x32xf32>
    %407 = vector.extract_strided_slice %399 {offsets = [0, 96], sizes = [2, 32], strides = [1, 1]} : vector<2x128xf32> to vector<2x32xf32>
    %408 = math.tanh %406 : vector<2x32xf32>
    %409 = arith.mulf %407, %408 : vector<2x32xf32>
    %cst_38 = arith.constant dense<0.000000e+00> : vector<2x128xf32>
    %410 = tpu.matmul %409, %7, %cst_38 {dimension_numbers = #tpu.dot_dimension_numbers<[1], [0], [0], [1], [0, 0, 1, 1], [], []>} : vector<2x32xf32>, vector<32x128xf32>, vector<2x128xf32> -> vector<2x128xf32>
    %411 = arith.addf %40, %410 : vector<2x128xf32>
    %412 = arith.negf %411 : vector<2x128xf32>
    %413 = math.exp %412 : vector<2x128xf32>
    %cst_39 = arith.constant 1.000000e+00 : f32
    %414 = vector.broadcast %cst_39 : f32 to vector<2x128xf32>
    %415 = arith.addf %414, %413 : vector<2x128xf32>
    %416 = arith.divf %414, %415 : vector<2x128xf32>
    %417 = math.tanh %411 : vector<2x128xf32>
    %418 = vector.extract_strided_slice %416 {offsets = [0, 32], sizes = [2, 32], strides = [1, 1]} : vector<2x128xf32> to vector<2x32xf32>
    %419 = arith.mulf %418, %406 : vector<2x32xf32>
    %420 = vector.extract_strided_slice %416 {offsets = [0, 0], sizes = [2, 32], strides = [1, 1]} : vector<2x128xf32> to vector<2x32xf32>
    %421 = vector.extract_strided_slice %417 {offsets = [0, 64], sizes = [2, 32], strides = [1, 1]} : vector<2x128xf32> to vector<2x32xf32>
    %422 = arith.mulf %420, %421 : vector<2x32xf32>
    %423 = arith.addf %419, %422 : vector<2x32xf32>
    %424 = vector.extract_strided_slice %416 {offsets = [0, 96], sizes = [2, 32], strides = [1, 1]} : vector<2x128xf32> to vector<2x32xf32>
    %425 = math.tanh %423 : vector<2x32xf32>
    %426 = arith.mulf %424, %425 : vector<2x32xf32>
    %cst_40 = arith.constant dense<0.000000e+00> : vector<2x128xf32>
    %427 = tpu.matmul %290, %8, %cst_40 {dimension_numbers = #tpu.dot_dimension_numbers<[1], [0], [0], [1], [0, 0, 1, 1], [], []>} : vector<2x32xf32>, vector<32x128xf32>, vector<2x128xf32> -> vector<2x128xf32>
    %428 = arith.addf %41, %427 : vector<2x128xf32>
    %429 = arith.negf %428 : vector<2x128xf32>
    %430 = math.exp %429 : vector<2x128xf32>
    %cst_41 = arith.constant 1.000000e+00 : f32
    %431 = vector.broadcast %cst_41 : f32 to vector<2x128xf32>
    %432 = arith.addf %431, %430 : vector<2x128xf32>
    %433 = arith.divf %431, %432 : vector<2x128xf32>
    %434 = math.tanh %428 : vector<2x128xf32>
    %435 = vector.extract_strided_slice %433 {offsets = [0, 32], sizes = [2, 32], strides = [1, 1]} : vector<2x128xf32> to vector<2x32xf32>
    %436 = arith.mulf %435, %287 : vector<2x32xf32>
    %437 = vector.extract_strided_slice %433 {offsets = [0, 0], sizes = [2, 32], strides = [1, 1]} : vector<2x128xf32> to vector<2x32xf32>
    %438 = vector.extract_strided_slice %434 {offsets = [0, 64], sizes = [2, 32], strides = [1, 1]} : vector<2x128xf32> to vector<2x32xf32>
    %439 = arith.mulf %437, %438 : vector<2x32xf32>
    %440 = arith.addf %436, %439 : vector<2x32xf32>
    %441 = vector.extract_strided_slice %433 {offsets = [0, 96], sizes = [2, 32], strides = [1, 1]} : vector<2x128xf32> to vector<2x32xf32>
    %442 = math.tanh %440 : vector<2x32xf32>
    %443 = arith.mulf %441, %442 : vector<2x32xf32>
    %444 = tpu.concatenate %279, %73, %426, %443 in 1 : vector<2x32xf32>, vector<2x32xf32>, vector<2x32xf32>, vector<2x32xf32> -> vector<2x128xf32>
    %c0_42 = arith.constant 0 : index
    %c0_43 = arith.constant 0 : index
    %445 = vector.load %arg4[%c0_42, %c0_43] : memref<128x128xf32, #tpu.memory_space<vmem>>, vector<128x128xf32>
    %cst_44 = arith.constant dense<0.000000e+00> : vector<2x128xf32>
    %446 = tpu.matmul %444, %445, %cst_44 {dimension_numbers = #tpu.dot_dimension_numbers<[1], [0], [0], [1], [0, 0, 1, 1], [], []>} : vector<2x128xf32>, vector<128x128xf32>, vector<2x128xf32> -> vector<2x128xf32>
    %c0_45 = arith.constant 0 : index
    %c0_46 = arith.constant 0 : index
    %447 = vector.load %arg5[%c0_45, %c0_46] : memref<1x128xf32, #tpu.memory_space<vmem>>, vector<1x128xf32>
    %448 = vector.broadcast %447 : vector<1x128xf32> to vector<2x128xf32>
    %449 = arith.addf %446, %448 : vector<2x128xf32>
    %cst_47 = arith.constant dense<0xFF800000> : vector<2xf32>
    %450 = vector.multi_reduction <maximumf>, %449, %cst_47 [1] : vector<2x128xf32> to vector<2xf32>
    %451 = vector.shape_cast %450 : vector<2xf32> to vector<2x1xf32>
    %452 = vector.broadcast %451 : vector<2x1xf32> to vector<2x128xf32>
    %453 = arith.subf %449, %452 : vector<2x128xf32>
    %454 = math.exp %453 : vector<2x128xf32>
    %cst_48 = arith.constant dense<0.000000e+00> : vector<2xf32>
    %455 = vector.multi_reduction <add>, %454, %cst_48 [1] : vector<2x128xf32> to vector<2xf32>
    %456 = vector.shape_cast %455 : vector<2xf32> to vector<2x1xf32>
    %457 = math.log %456 : vector<2x1xf32>
    %458 = vector.broadcast %457 : vector<2x1xf32> to vector<2x128xf32>
    %459 = arith.subf %453, %458 : vector<2x128xf32>
    %460 = vector.extract_strided_slice %459 {offsets = [0, 0], sizes = [2, 3], strides = [1, 1]} : vector<2x128xf32> to vector<2x3xf32>
    %c0_49 = arith.constant 0 : index
    %c0_50 = arith.constant 0 : index
    %461 = vector.load %arg6[%c0_49, %c0_50] : memref<2x3xf32, #tpu.memory_space<vmem>>, vector<2x3xf32>
    tpu.vector_store %arg6[%c0_49, %c0_50], %460 {strides = array<i32>} : memref<2x3xf32, #tpu.memory_space<vmem>>, vector<2x3xf32>,
    return
  }
}

</mosaic_0001>

<bundles_post_ra>
// kernel: bilstm_nli_forward.1
= control target key start
LH: loop header
LB: loop body
LE: loop exit
PB: predicated region body
PF: predicated region fallthrough
CT: control target
= control target key end

     0   :  { %v2933_v7 = vmov 0.0   ;;  %s3434_s0 = inlined_call_operand.vmem [shape: f32[32,32], index: 0, kind: input, shape index: {}]   ;;  %s3435_s1 = inlined_call_operand.vmem [shape: f32[32,256], index: 1, kind: input, shape index: {}]   ;;  %s3436_s2 = inlined_call_operand.vmem [shape: f32[32,256], index: 2, kind: input, shape index: {}]   ;;  %s3437_s3 = inlined_call_operand.vmem [shape: f32[1,256], index: 3, kind: input, shape index: {}]   ;;  %s3438_s4 = inlined_call_operand.vmem [shape: f32[128,128], index: 4, kind: input, shape index: {}]   ;;  %s3439_s5 = inlined_call_operand.vmem [shape: f32[1,128], index: 5, kind: input, shape index: {}]   ;;  %s3440_s6 = inlined_call_operand.hbm [shape: f32[2,3], index: 6, kind: output, shape index: {}]  }
   0x1   :  { %v29_v0 = vld [vmem:[%s3435_s1 + $0x8] sm:$0xff]  ;;  %v31_v1 = vld [vmem:[%s3435_s1 + $0x18] sm:$0xff]  ;;  %v28_v2 = vld [vmem:[%s3435_s1] sm:$0xff]  ;;  %125 = vmatprep.mubr.f32.mxu0 %v2933_v7  ;;  %396 = vmatprep.mubr.f32.mxu1 %v2933_v7 }
   0x2   :  { %v2548_v3 = vpack.c.bf16 %v31_v1, %v29_v0  ;;  %v30_v4 = vld [vmem:[%s3435_s1 + $0x10] sm:$0xff]  ;;  %v33_v5 = vld [vmem:[%s3435_s1 + $0x28] sm:$0xff]  ;;  %v35_v6 = vld [vmem:[%s3435_s1 + $0x38] sm:$0xff] }
   0x3   :  { %v2550_v8 = vpack.c.bf16 %v30_v4, %v28_v2  ;;  %v2552_v9 = vpack.c.bf16 %v35_v6, %v33_v5  ;;  %v32_v10 = vld [vmem:[%s3435_s1 + $0x20] sm:$0xff]  ;;  %v34_v11 = vld [vmem:[%s3435_s1 + $0x30] sm:$0xff]  ;;  %v150_v12 = vld [vmem:[%s3436_s2 + $0x8] sm:$0xff] }
   0x4   :  { %2549 = vmatprep.subr.bf16.mxu0 %v2548_v3  ;;  %v152_v13 = vld [vmem:[%s3436_s2 + $0x18] sm:$0xff]  ;;  %v149_v14 = vld [vmem:[%s3436_s2] sm:$0xff]  ;;  %v2554_v15 = vpack.c.bf16 %v34_v11, %v32_v10  ;;  %v151_v17 = vld [vmem:[%s3436_s2 + $0x10] sm:$0xff] }
   0x5   :  { %2551 = vmatpush1.bf16.msra.mxu0 %v2550_v8  ;;  %v3010_v16 = vpack.c.bf16 %v152_v13, %v150_v12  ;;  %v3015_v18 = vpack.c.bf16 %v151_v17, %v149_v14  ;;  %v154_v19 = vld [vmem:[%s3436_s2 + $0x28] sm:$0xff]  ;;  %v156_v20 = vld [vmem:[%s3436_s2 + $0x38] sm:$0xff]  ;;  %v153_v22 = vld [vmem:[%s3436_s2 + $0x20] sm:$0xff] }
   0x6   :  { %2553 = vmatprep.subr.bf16.mxu0 %v2552_v9  ;;  %v3023_v21 = vpack.c.bf16 %v156_v20, %v154_v19  ;;  %v155_v23 = vld [vmem:[%s3436_s2 + $0x30] sm:$0xff] }
   0x7   :  { %2565 = vmatprep.subr.bf16.mxu1 %v3010_v16 }
   0x8   :  { %2567 = vmatpush1.bf16.msra.mxu1 %v3015_v18 }
   0x9   :  { %11 = vsyncpa [#allocation3], 0  ;;  %2555 = vmatpush1.bf16.msra.mxu0 %v2554_v15  ;;  %v24_v24 = vld [vmem:[%s3434_s0] sm:$0xff]  ;;  %vm48_vm0 = vcmask 261120   ;;  %2569 = vmatprep.subr.bf16.mxu1 %v3023_v21  ;;  %v3038_v25 = vpack.c.bf16 %v155_v23, %v153_v22  ;;  %v25_v26 = vld [vmem:[%s3434_s0 + $0x8] sm:$0xff]  ;;  %v38_v29 = vlaneseq  ;;  %vm163_vm1 = vcmask 1041408  }
   0xa   :  { %2557 = vmatprep.subr.bf16.mxu0 %v3010_v16  ;;  %v26_v27 = vld [vmem:[%s3434_s0 + $0x10] sm:$0xff]  ;;  %v27_v28 = vld [vmem:[%s3434_s0 + $0x18] sm:$0xff]  ;;  %v36_v32 = vld [vmem:[%s3437_s3] sm:$0x3]  ;;  %s2934_s3 = smov 64   ;;  %s2935_s12 = smov 32  }
   0xb   :  { %v39_v30 = vshrl.u32 %v38_v29, 7  ;;  %vm2937_vm2 = vmmov 0   ;;  %s2938_s17 = smov 96   ;;  %vm2181_vm3 = vcmask 523264   ;;  %vm2183_vm4 = vcmask 785408   ;;  %s2939_s19 = smov [#allocation2]  }
   0xc   :  { %2306 = vmatmul.mubr.msk.f32.vlgmr.msra.gmra.mrb[0].mxu0 %vm48_vm0, %v24_v24  ;;  %2571 = vmatpush1.bf16.msra.mxu1 %v3038_v25  ;;  %s2298_s20 = sshll.u32 %s2939_s19, 4  ;;  %vm2290_vm5 = vcmask 17408   ;;  %s2299_s20 = int_to_ptr.vmem [resolvable:$true] %s2298_s20 }
   0xd   :  { %2559 = vmatpush1.bf16.msra.mxu0 %v3015_v18  ;;  %131 = vmatprep.mubr.f32.mxu0 %v2933_v7  ;;  %v40_v31 = vsub.s32 0, %v39_v30  ;;  %v44_v33 = vsub.s32 1, %v39_v30  ;;  %p2914_p1 = scmp.lt.s32.totalorder %s2299_s20, %s2299_s20 }
   0xe   :  { %2561 = vmatprep.subr.bf16.mxu0 %v3023_v21  ;;  %2581 = vmatprep.subr.bf16.mxu1 %v3010_v16 }
   0xf   :  { %v41_v34 = vrot.slane %v36_v32, %v40_v31  ;;  %v45_v35 = vrot.slane %v36_v32, %v44_v33 }
  0x10   :  { %2307 = vmatmul.mubr.msk.f32.gmra.mrb[2].mxu0 %vm48_vm0, %v25_v26 }
  0x11   :  { %137 = vmatprep.mubr.f32.mxu0 %v2933_v7  ;;  %2563 = vmatpush1.bf16.msra.mxu0 %v3038_v25 }
  0x12   :  { %2573 = vmatprep.subr.bf16.mxu0 %v3010_v16 }
  0x14   :  { %2308 = vmatmul.mubr.msk.f32.gmra.mrb[4].mxu0 %vm48_vm0, %v26_v27 }
  0x15   :  { %142 = vmatprep.mubr.f32.mxu0 %v2933_v7 }
  0x18   :  { %2309 = vmatmul.mubr.msk.f32.gmra.mrb[6].mxu0 %vm48_vm0, %v27_v28 }
  0x19   :  { %269 = vmatprep.mubr.f32.mxu0 %v2933_v7 }
  0x1c   :  { %270 = vmatmul.mubr.f32.vlgmr.msra.gmra.mrb[8].mxu0 %v2933_v7 }
  0x1d   :  { %2575 = vmatpush1.bf16.msra.mxu0 %v3015_v18  ;;  %523 = vmatprep.mubr.f32.mxu0 %v2933_v7 }
  0x1e   :  { %2577 = vmatprep.subr.bf16.mxu0 %v3023_v21 }
  0x21   :  { %2579 = vmatpush1.bf16.msra.mxu0 %v3038_v25 }
  0x22   :  { %2589 = vmatprep.subr.bf16.mxu0 %v3010_v16 }
  0xdf   :  { %v127_v36 = vpop.f32.mrb[0].mxu0 }
  0xe0   :  { %v128_v37 = vadd.f32 %v127_v36, %v41_v34  ;;  %v129_v38 = vpop.f32.mrb[1].mxu0 }
  0xe1   :  { %v130_v39 = vadd.f32 %v129_v38, %v45_v35 }
  0xe2   :  { %v168_v43 = vrot.slane %v128_v37, 2  ;;  %v178_v44 = vrot.slane %v128_v37, 4  ;;  %v184_v45 = vrot.slane %v128_v37, 6 }
  0xe3   :  { %v133_v40 = vpop.f32.mrb[2].mxu0  ;;  %v169_v47 = vrot.slane %v130_v39, 2  ;;  %v179_v48 = vrot.slane %v130_v39, 4  ;;  %v185_v49 = vrot.slane %v130_v39, 6 }
  0xe4   :  { %v134_v41 = vadd.f32 %v133_v40, %v41_v34  ;;  %v135_v42 = vpop.f32.mrb[3].mxu0 }
  0xe5   :  { %v136_v46 = vadd.f32 %v135_v42, %v45_v35 }
  0xe6   :  { %v159_v50 = vrot.slane %v134_v41, 4  ;;  %v172_v51 = vrot.slane %v134_v41, 2  ;;  %v3073_v52 = vsel %vm163_vm1, %v178_v44, %v134_v41  ;;  %v188_v53 = vrot.slane %v134_v41, 6 }
  0xe7   :  { %v139_v54 = vpop.f32.mrb[4].mxu0  ;;  %v160_v55 = vrot.slane %v136_v46, 4  ;;  %v173_v56 = vrot.slane %v136_v46, 2  ;;  %v3076_v57 = vsel %vm163_vm1, %v179_v48, %v136_v46  ;;  %v189_v58 = vrot.slane %v136_v46, 6 }
  0xe8   :  { %v3078_v59 = vadd.f32 %v139_v54, %v41_v34  ;;  %v141_v60 = vpop.f32.mrb[5].mxu0  ;;  %v164_v61 = vsel %vm163_vm1, %v128_v37, %v159_v50  ;;  %v3082_v62 = vsel %vm163_vm1, %v168_v43, %v172_v51  ;;  %v3085_v63 = vsel %vm163_vm1, %v184_v45, %v188_v53 }
  0xe9   :  { %v165_v0 = vsel %vm163_vm1, %v130_v39, %v160_v55  ;;  %v3089_v1 = vsel %vm163_vm1, %v169_v47, %v173_v56  ;;  %v3092_v2 = vsel %vm163_vm1, %v185_v49, %v189_v58  ;;  %v3095_v3 = vsel %vm163_vm1, %v134_v41, %v178_v44 }
  0xea   :  { %v3098_v4 = vsel %vm163_vm1, %v136_v46, %v179_v48  ;;  %v3101_v5 = vsel %vm163_vm1, %v172_v51, %v168_v43  ;;  %v3104_v6 = vsel %vm163_vm1, %v173_v56, %v169_v47  ;;  %v3107_v8 = vsel %vm163_vm1, %v159_v50, %v128_v37 }
  0xeb   :  { %v144_v9 = vpop.f32.mrb[6].mxu0  ;;  %v3110_v10 = vsel %vm163_vm1, %v160_v55, %v130_v39  ;;  %v3113_v11 = vsel %vm163_vm1, %v188_v53, %v184_v45  ;;  %v3116_v12 = vsel %vm163_vm1, %v189_v58, %v185_v49 }
  0xec   :  { %v3118_v13 = vadd.f32 %v144_v9, %v41_v34  ;;  %v146_v14 = vpop.f32.mrb[7].mxu0 }
  0xed   :  { %v3120_v15 = vadd.f32 %v146_v14, %v45_v35 }
  0xef   :  { %v271_v17 = vpop.f32.mrb[8].mxu0 }
  0xf0   :  { %v276_v19 = vadd.f32 %v271_v17, %v164_v61  ;;  %v273_v20 = vpop.f32.mrb[9].mxu0 }
  0xf1   :  { %v277_v22 = vadd.f32 %v273_v20, %v165_v0 }
  0xf2   :  { %2705 = vtanh.f32 %v276_v19  ;;  %v2310_v26 = vmul.f32 -1.442695, %v276_v19 }
  0xf3   :  { %2707 = vtanh.f32 %v277_v22  ;;  %v2311_v27 = vmul.f32 -1.442695, %v277_v22 }
  0xf4   :  { %2709 = vpow2.f32 %v2310_v26 }
  0xf5   :  { %2711 = vpow2.f32 %v2311_v27 }
  0xfc   :  { %v2706_v23 = vpop.eup %2705 }
  0xfd   :  { %294 = vrot.lane.b32.xlu0 %v2706_v23, %s2934_s3  ;;  %v2708_v24 = vpop.eup %2707 }
  0xfe   :  { %v2710_v28 = vpop.eup %2709 }
  0xff   :  { %v284_v29 = vadd.f32 1.0, %v2710_v28  ;;  %v2712_v30 = vpop.eup %2711 }
 0x100   :  { %v285_v31 = vadd.f32 1.0, %v2712_v30 }
 0x101   :  { %311 = vrot.lane.b32.xlu0 %v2708_v24, %s2934_s3  ;;  %2713 = vrcp.f32 %v284_v29 }
 0x102   :  { %2715 = vrcp.f32 %v285_v31 }
 0x10b   :  { %v2714_v32 = vpop.eup %2713 }
 0x10c   :  { %v2716_v35 = vpop.eup %2715  ;;  %v292_v38 = vmul.f32 0.0, %v2714_v32 }
 0x10d   :  { %v309_v41 = vmul.f32 0.0, %v2716_v35 }
 0x16f   :  { %v295_v33 = vpop.permute.xlu0 %294 }
 0x170   :  { %v297_v34 = vmul.f32 %v2714_v32, %v295_v33 }
 0x172   :  { %299 = vrot.lane.b32.xlu1 %v297_v34, %s2935_s12 }
 0x173   :  { %v312_v36 = vpop.permute.xlu0 %311 }
 0x174   :  { %v314_v37 = vmul.f32 %v2716_v35, %v312_v36 }
 0x176   :  { %316 = vrot.lane.b32.xlu1 %v314_v37, %s2935_s12 }
 0x1e4   :  { %v300_v39 = vpop.permute.xlu1 %299 }
 0x1e5   :  { %v302_v40 = vadd.f32 %v300_v39, %v292_v38 }
 0x1e7   :  { %2717 = vtanh.f32 %v302_v40 }
 0x1e8   :  { %v317_v42 = vpop.permute.xlu1 %316 }
 0x1e9   :  { %v319_v43 = vadd.f32 %v317_v42, %v309_v41 }
 0x1eb   :  { %2719 = vtanh.f32 %v319_v43 }
 0x1f1   :  { %v2718_v44 = vpop.eup %2717 }
 0x1f2   :  { %305 = vrot.lane.b32.xlu0 %v2718_v44, %s2934_s3 }
 0x1f5   :  { %v2720_v45 = vpop.eup %2719 }
 0x1f6   :  { %322 = vrot.lane.b32.xlu1 %v2720_v45, %s2934_s3 }
 0x264   :  { %v306_v46 = vpop.permute.xlu0 %305 }
 0x265   :  { %v308_v48 = vmul.f32 %v2714_v32, %v306_v46 }
 0x268   :  { %v323_v47 = vpop.permute.xlu1 %322 }
 0x269   :  { %v3128_v49 = vmul.f32 %v2716_v35, %v323_v47 }
 0x26b   :  { %v326_v50 = vsel %vm163_vm1, %v308_v48, %v3128_v49 }
 0x26c   :  { %328 = vrot.lane.b32.xlu0 %v326_v50, %s2935_s12 }
 0x2de   :  { %v329_v51 = vpop.permute.xlu0 %328 }
 0x2df   :  { %2312 = vmatmul.mubr.msk.f32.vlgmr.msra.gmra.mrb[0].mxu1 %vm48_vm0, %v329_v51 }
 0x2e0   :  { %2583 = vmatpush1.bf16.msra.mxu1 %v3015_v18  ;;  %650 = vmatprep.mubr.f32.mxu1 %v2933_v7 }
 0x2e1   :  { %2585 = vmatprep.subr.bf16.mxu1 %v3023_v21 }
 0x2e4   :  { %2587 = vmatpush1.bf16.msra.mxu1 %v3038_v25 }
 0x2e5   :  { %2597 = vmatprep.subr.bf16.mxu1 %v3010_v16 }
 0x3b2   :  { %v398_v53 = vpop.f32.mrb[0].mxu1 }
 0x3b3   :  { %v403_v54 = vadd.f32 %v398_v53, %v3082_v62  ;;  %v400_v55 = vpop.f32.mrb[1].mxu1 }
 0x3b4   :  { %v404_v56 = vadd.f32 %v400_v55, %v3089_v1 }
 0x3b5   :  { %2721 = vtanh.f32 %v403_v54  ;;  %v2313_v61 = vmul.f32 -1.442695, %v403_v54 }
 0x3b6   :  { %2723 = vtanh.f32 %v404_v56  ;;  %v2314_v0 = vmul.f32 -1.442695, %v404_v56 }
 0x3b7   :  { %2725 = vpow2.f32 %v2313_v61 }
 0x3b8   :  { %2727 = vpow2.f32 %v2314_v0 }
 0x3bf   :  { %v2722_v58 = vpop.eup %2721 }
 0x3c0   :  { %v2724_v60 = vpop.eup %2723  ;;  %421 = vrot.lane.b32.xlu1 %v2722_v58, %s2934_s3 }
 0x3c1   :  { %438 = vrot.lane.b32.xlu0 %v2724_v60, %s2934_s3  ;;  %v2726_v9 = vpop.eup %2725 }
 0x3c2   :  { %v2728_v14 = vpop.eup %2727  ;;  %v411_v17 = vadd.f32 1.0, %v2726_v9 }
 0x3c3   :  { %v412_v19 = vadd.f32 1.0, %v2728_v14 }
 0x3c4   :  { %2729 = vrcp.f32 %v411_v17 }
 0x3c5   :  { %2731 = vrcp.f32 %v412_v19 }
 0x3ce   :  { %v2730_v62 = vpop.eup %2729 }
 0x3cf   :  { %v2732_v20 = vpop.eup %2731  ;;  %v419_v26 = vmul.f32 %v2730_v62, %v302_v40 }
 0x3d0   :  { %v436_v28 = vmul.f32 %v2732_v20, %v319_v43 }
 0x432   :  { %v422_v1 = vpop.permute.xlu1 %421 }
 0x433   :  { %v424_v22 = vmul.f32 %v2730_v62, %v422_v1  ;;  %v439_v23 = vpop.permute.xlu0 %438 }
 0x434   :  { %v441_v24 = vmul.f32 %v2732_v20, %v439_v23 }
 0x435   :  { %426 = vrot.lane.b32.xlu1 %v424_v22, %s2935_s12 }
 0x436   :  { %443 = vrot.lane.b32.xlu0 %v441_v24, %s2935_s12 }
 0x4a7   :  { %v427_v27 = vpop.permute.xlu1 %426 }
 0x4a8   :  { %v429_v29 = vadd.f32 %v427_v27, %v419_v26  ;;  %v444_v30 = vpop.permute.xlu0 %443 }
 0x4a9   :  { %v446_v31 = vadd.f32 %v444_v30, %v436_v28 }
 0x4aa   :  { %2733 = vtanh.f32 %v429_v29 }
 0x4ab   :  { %2735 = vtanh.f32 %v446_v31 }
 0x4b4   :  { %v2734_v32 = vpop.eup %2733 }
 0x4b5   :  { %v2736_v33 = vpop.eup %2735  ;;  %432 = vrot.lane.b32.xlu1 %v2734_v32, %s2934_s3 }
 0x4b6   :  { %449 = vrot.lane.b32.xlu0 %v2736_v33, %s2934_s3 }
 0x527   :  { %v433_v34 = vpop.permute.xlu1 %432 }
 0x528   :  { %v435_v35 = vmul.f32 %v2730_v62, %v433_v34  ;;  %v450_v36 = vpop.permute.xlu0 %449 }
 0x529   :  { %v452_v37 = vmul.f32 %v2732_v20, %v450_v36 }
 0x52b   :  { %v453_v38 = vsel %vm163_vm1, %v435_v35, %v452_v37 }
 0x52c   :  { %455 = vrot.lane.b32.xlu1 %v453_v38, %s2935_s12 }
 0x59e   :  { %v456_v39 = vpop.permute.xlu1 %455 }
 0x59f   :  { %2315 = vmatmul.mubr.msk.f32.vlgmr.msra.gmra.mrb[10].mxu0 %vm48_vm0, %v456_v39 }
 0x5a0   :  { %2591 = vmatpush1.bf16.msra.mxu0 %v3015_v18  ;;  %777 = vmatprep.mubr.f32.mxu0 %v2933_v7 }
 0x5a1   :  { %2593 = vmatprep.subr.bf16.mxu0 %v3023_v21 }
 0x5a4   :  { %2595 = vmatpush1.bf16.msra.mxu0 %v3038_v25 }
 0x5a5   :  { %2605 = vmatprep.subr.bf16.mxu0 %v3010_v16 }
 0x672   :  { %v525_v40 = vpop.f32.mrb[10].mxu0 }
 0x673   :  { %v530_v41 = vadd.f32 %v525_v40, %v3073_v52  ;;  %v527_v42 = vpop.f32.mrb[11].mxu0 }
 0x674   :  { %v531_v43 = vadd.f32 %v527_v42, %v3076_v57 }
 0x675   :  { %2737 = vtanh.f32 %v530_v41  ;;  %v2316_v46 = vmul.f32 -1.442695, %v530_v41 }
 0x676   :  { %2739 = vtanh.f32 %v531_v43  ;;  %v2317_v47 = vmul.f32 -1.442695, %v531_v43 }
 0x677   :  { %2741 = vpow2.f32 %v2316_v46 }
 0x678   :  { %2743 = vpow2.f32 %v2317_v47 }
 0x67f   :  { %v2738_v44 = vpop.eup %2737 }
 0x680   :  { %v2740_v45 = vpop.eup %2739  ;;  %548 = vrot.lane.b32.xlu0 %v2738_v44, %s2934_s3 }
 0x681   :  { %565 = vrot.lane.b32.xlu1 %v2740_v45, %s2934_s3  ;;  %v2742_v48 = vpop.eup %2741 }
 0x682   :  { %v2744_v50 = vpop.eup %2743  ;;  %v538_v51 = vadd.f32 1.0, %v2742_v48 }
 0x683   :  { %v539_v53 = vadd.f32 1.0, %v2744_v50 }
 0x684   :  { %2745 = vrcp.f32 %v538_v51 }
 0x685   :  { %2747 = vrcp.f32 %v539_v53 }
 0x68e   :  { %v2746_v52 = vpop.eup %2745 }
 0x68f   :  { %v2748_v54 = vpop.eup %2747  ;;  %v546_v60 = vmul.f32 %v2746_v52, %v429_v29 }
 0x690   :  { %v563_v0 = vmul.f32 %v2748_v54, %v446_v31 }
 0x6f2   :  { %v549_v57 = vpop.permute.xlu0 %548 }
 0x6f3   :  { %v551_v55 = vmul.f32 %v2746_v52, %v549_v57  ;;  %v566_v56 = vpop.permute.xlu1 %565 }
 0x6f4   :  { %v568_v58 = vmul.f32 %v2748_v54, %v566_v56 }
 0x6f5   :  { %553 = vrot.lane.b32.xlu0 %v551_v55, %s2935_s12 }
 0x6f6   :  { %570 = vrot.lane.b32.xlu1 %v568_v58, %s2935_s12 }
 0x767   :  { %v554_v61 = vpop.permute.xlu0 %553 }
 0x768   :  { %v556_v9 = vadd.f32 %v554_v61, %v546_v60  ;;  %v571_v14 = vpop.permute.xlu1 %570 }
 0x769   :  { %v573_v17 = vadd.f32 %v571_v14, %v563_v0 }
 0x76a   :  { %2749 = vtanh.f32 %v556_v9 }
 0x76b   :  { %2751 = vtanh.f32 %v573_v17 }
 0x774   :  { %v2750_v19 = vpop.eup %2749 }
 0x775   :  { %v2752_v62 = vpop.eup %2751  ;;  %559 = vrot.lane.b32.xlu0 %v2750_v19, %s2934_s3 }
 0x776   :  { %576 = vrot.lane.b32.xlu1 %v2752_v62, %s2934_s3 }
 0x7e7   :  { %v560_v1 = vpop.permute.xlu0 %559 }
 0x7e8   :  { %v562_v20 = vmul.f32 %v2746_v52, %v560_v1  ;;  %v577_v22 = vpop.permute.xlu1 %576 }
 0x7e9   :  { %v579_v23 = vmul.f32 %v2748_v54, %v577_v22 }
 0x7eb   :  { %v580_v24 = vsel %vm163_vm1, %v562_v20, %v579_v23 }
 0x7ec   :  { %582 = vrot.lane.b32.xlu0 %v580_v24, %s2935_s12 }
 0x85e   :  { %v583_v26 = vpop.permute.xlu0 %582 }
 0x85f   :  { %2318 = vmatmul.mubr.msk.f32.vlgmr.msra.gmra.mrb[2].mxu1 %vm48_vm0, %v583_v26 }
 0x860   :  { %2599 = vmatpush1.bf16.msra.mxu1 %v3015_v18  ;;  %904 = vmatprep.mubr.f32.mxu1 %v2933_v7 }
 0x861   :  { %2601 = vmatprep.subr.bf16.mxu1 %v3023_v21 }
 0x864   :  { %2603 = vmatpush1.bf16.msra.mxu1 %v3038_v25 }
 0x865   :  { %2613 = vmatprep.subr.bf16.mxu1 %v3010_v16 }
 0x932   :  { %v652_v27 = vpop.f32.mrb[2].mxu1 }
 0x933   :  { %v657_v28 = vadd.f32 %v652_v27, %v3085_v63  ;;  %v654_v29 = vpop.f32.mrb[3].mxu1 }
 0x934   :  { %v658_v30 = vadd.f32 %v654_v29, %v3092_v2 }
 0x935   :  { %2753 = vtanh.f32 %v657_v28  ;;  %v2319_v33 = vmul.f32 -1.442695, %v657_v28 }
 0x936   :  { %2755 = vtanh.f32 %v658_v30  ;;  %v2320_v34 = vmul.f32 -1.442695, %v658_v30 }
 0x937   :  { %2757 = vpow2.f32 %v2319_v33 }
 0x938   :  { %2759 = vpow2.f32 %v2320_v34 }
 0x93f   :  { %v2754_v31 = vpop.eup %2753 }
 0x940   :  { %v2756_v32 = vpop.eup %2755  ;;  %675 = vrot.lane.b32.xlu1 %v2754_v31, %s2934_s3 }
 0x941   :  { %692 = vrot.lane.b32.xlu0 %v2756_v32, %s2934_s3  ;;  %v2758_v35 = vpop.eup %2757 }
 0x942   :  { %v2760_v36 = vpop.eup %2759  ;;  %v665_v37 = vadd.f32 1.0, %v2758_v35 }
 0x943   :  { %v666_v38 = vadd.f32 1.0, %v2760_v36 }
 0x944   :  { %2761 = vrcp.f32 %v665_v37 }
 0x945   :  { %2763 = vrcp.f32 %v666_v38 }
 0x94e   :  { %v2762_v63 = vpop.eup %2761 }
 0x94f   :  { %v2764_v39 = vpop.eup %2763  ;;  %v673_v43 = vmul.f32 %v2762_v63, %v556_v9 }
 0x950   :  { %v690_v45 = vmul.f32 %v2764_v39, %v573_v17 }
 0x9b2   :  { %v676_v2 = vpop.permute.xlu1 %675 }
 0x9b3   :  { %v678_v40 = vmul.f32 %v2762_v63, %v676_v2  ;;  %v693_v41 = vpop.permute.xlu0 %692 }
 0x9b4   :  { %v695_v42 = vmul.f32 %v2764_v39, %v693_v41 }
 0x9b5   :  { %680 = vrot.lane.b32.xlu1 %v678_v40, %s2935_s12 }
 0x9b6   :  { %697 = vrot.lane.b32.xlu0 %v695_v42, %s2935_s12 }
 0xa27   :  { %v681_v44 = vpop.permute.xlu1 %680 }
 0xa28   :  { %v683_v46 = vadd.f32 %v681_v44, %v673_v43  ;;  %v698_v47 = vpop.permute.xlu0 %697 }
 0xa29   :  { %v700_v48 = vadd.f32 %v698_v47, %v690_v45 }
 0xa2a   :  { %2765 = vtanh.f32 %v683_v46 }
 0xa2b   :  { %2767 = vtanh.f32 %v700_v48 }
 0xa34   :  { %v2766_v50 = vpop.eup %2765 }
 0xa35   :  { %v2768_v51 = vpop.eup %2767  ;;  %686 = vrot.lane.b32.xlu1 %v2766_v50, %s2934_s3 }
 0xa36   :  { %703 = vrot.lane.b32.xlu0 %v2768_v51, %s2934_s3 }
 0xaa7   :  { %v687_v53 = vpop.permute.xlu1 %686 }
 0xaa8   :  { %v689_v52 = vmul.f32 %v2762_v63, %v687_v53  ;;  %v704_v57 = vpop.permute.xlu0 %703 }
 0xaa9   :  { %v706_v54 = vmul.f32 %v2764_v39, %v704_v57 }
 0xaab   :  { %v707_v55 = vsel %vm163_vm1, %v689_v52, %v706_v54 }
 0xaac   :  { %709 = vrot.lane.b32.xlu1 %v707_v55, %s2935_s12 }
 0xb1e   :  { %v710_v56 = vpop.permute.xlu1 %709 }
 0xb1f   :  { %2321 = vmatmul.mubr.msk.f32.vlgmr.msra.gmra.mrb[12].mxu0 %vm48_vm0, %v710_v56 }
 0xb20   :  { %2607 = vmatpush1.bf16.msra.mxu0 %v3015_v18  ;;  %1031 = vmatprep.mubr.f32.mxu0 %v2933_v7 }
 0xb21   :  { %2609 = vmatprep.subr.bf16.mxu0 %v3023_v21 }
 0xb24   :  { %2611 = vmatpush1.bf16.msra.mxu0 %v3038_v25 }
 0xbf2   :  { %v779_v58 = vpop.f32.mrb[12].mxu0 }
 0xbf3   :  { %v784_v60 = vadd.f32 %v779_v58, %v3095_v3  ;;  %v781_v61 = vpop.f32.mrb[13].mxu0 }
 0xbf4   :  { %v785_v0 = vadd.f32 %v781_v61, %v3098_v4 }
 0xbf5   :  { %2769 = vtanh.f32 %v784_v60  ;;  %v2322_v17 = vmul.f32 -1.442695, %v784_v60 }
 0xbf6   :  { %2771 = vtanh.f32 %v785_v0  ;;  %v2323_v19 = vmul.f32 -1.442695, %v785_v0 }
 0xbf7   :  { %2773 = vpow2.f32 %v2322_v17 }
 0xbf8   :  { %2775 = vpow2.f32 %v2323_v19 }
 0xbff   :  { %v2770_v9 = vpop.eup %2769 }
 0xc00   :  { %v2772_v14 = vpop.eup %2771  ;;  %802 = vrot.lane.b32.xlu0 %v2770_v9, %s2934_s3 }
 0xc01   :  { %819 = vrot.lane.b32.xlu1 %v2772_v14, %s2934_s3  ;;  %v2774_v62 = vpop.eup %2773 }
 0xc02   :  { %v2776_v1 = vpop.eup %2775  ;;  %v792_v20 = vadd.f32 1.0, %v2774_v62 }
 0xc03   :  { %v793_v22 = vadd.f32 1.0, %v2776_v1 }
 0xc04   :  { %2777 = vrcp.f32 %v792_v20 }
 0xc05   :  { %2779 = vrcp.f32 %v793_v22 }
 0xc0e   :  { %v2778_v3 = vpop.eup %2777 }
 0xc0f   :  { %v2780_v23 = vpop.eup %2779  ;;  %v800_v28 = vmul.f32 %v2778_v3, %v683_v46 }
 0xc10   :  { %v817_v30 = vmul.f32 %v2780_v23, %v700_v48 }
 0xc72   :  { %v803_v4 = vpop.permute.xlu0 %802 }
 0xc73   :  { %v805_v24 = vmul.f32 %v2778_v3, %v803_v4  ;;  %v820_v26 = vpop.permute.xlu1 %819 }
 0xc74   :  { %v822_v27 = vmul.f32 %v2780_v23, %v820_v26 }
 0xc75   :  { %807 = vrot.lane.b32.xlu0 %v805_v24, %s2935_s12 }
 0xc76   :  { %824 = vrot.lane.b32.xlu1 %v822_v27, %s2935_s12 }
 0xce7   :  { %v808_v29 = vpop.permute.xlu0 %807 }
 0xce8   :  { %v810_v31 = vadd.f32 %v808_v29, %v800_v28  ;;  %v825_v32 = vpop.permute.xlu1 %824 }
 0xce9   :  { %v827_v33 = vadd.f32 %v825_v32, %v817_v30 }
 0xcea   :  { %2781 = vtanh.f32 %v810_v31 }
 0xceb   :  { %2783 = vtanh.f32 %v827_v33 }
 0xcf4   :  { %v2782_v34 = vpop.eup %2781 }
 0xcf5   :  { %v2784_v35 = vpop.eup %2783  ;;  %813 = vrot.lane.b32.xlu0 %v2782_v34, %s2934_s3 }
 0xcf6   :  { %830 = vrot.lane.b32.xlu1 %v2784_v35, %s2934_s3 }
 0xd67   :  { %v814_v36 = vpop.permute.xlu0 %813 }
 0xd68   :  { %v816_v37 = vmul.f32 %v2778_v3, %v814_v36  ;;  %v831_v38 = vpop.permute.xlu1 %830 }
 0xd69   :  { %v833_v63 = vmul.f32 %v2780_v23, %v831_v38 }
 0xd6b   :  { %v834_v2 = vsel %vm163_vm1, %v816_v37, %v833_v63 }
 0xd6c   :  { %836 = vrot.lane.b32.xlu0 %v834_v2, %s2935_s12 }
 0xdde   :  { %v837_v39 = vpop.permute.xlu0 %836 }
 0xddf   :  { %2324 = vmatmul.mubr.msk.f32.vlgmr.msra.gmra.mrb[4].mxu1 %vm48_vm0, %v837_v39 }
 0xde0   :  { %2615 = vmatpush1.bf16.msra.mxu1 %v3015_v18  ;;  %1158 = vmatprep.mubr.f32.mxu1 %v2933_v7 }
 0xde1   :  { %2617 = vmatprep.subr.bf16.mxu1 %v3023_v21 }
 0xde4   :  { %2619 = vmatpush1.bf16.msra.mxu1 %v3038_v25 }
 0xeb2   :  { %v906_v40 = vpop.f32.mrb[4].mxu1 }
 0xeb3   :  { %v911_v41 = vadd.f32 %v906_v40, %v3101_v5  ;;  %v908_v42 = vpop.f32.mrb[5].mxu1 }
 0xeb4   :  { %v912_v43 = vadd.f32 %v908_v42, %v3104_v6 }
 0xeb5   :  { %2785 = vtanh.f32 %v911_v41  ;;  %v2325_v46 = vmul.f32 -1.442695, %v911_v41 }
 0xeb6   :  { %2787 = vtanh.f32 %v912_v43  ;;  %v2326_v47 = vmul.f32 -1.442695, %v912_v43 }
 0xeb7   :  { %2789 = vpow2.f32 %v2325_v46 }
 0xeb8   :  { %2791 = vpow2.f32 %v2326_v47 }
 0xebf   :  { %v2786_v44 = vpop.eup %2785 }
 0xec0   :  { %v2788_v45 = vpop.eup %2787  ;;  %929 = vrot.lane.b32.xlu1 %v2786_v44, %s2934_s3 }
 0xec1   :  { %946 = vrot.lane.b32.xlu0 %v2788_v45, %s2934_s3  ;;  %v2790_v48 = vpop.eup %2789 }
 0xec2   :  { %v2792_v50 = vpop.eup %2791  ;;  %v919_v51 = vadd.f32 1.0, %v2790_v48 }
 0xec3   :  { %v920_v53 = vadd.f32 1.0, %v2792_v50 }
 0xec4   :  { %2793 = vrcp.f32 %v919_v51 }
 0xec5   :  { %2795 = vrcp.f32 %v920_v53 }
 0xece   :  { %v2794_v5 = vpop.eup %2793 }
 0xecf   :  { %v2796_v52 = vpop.eup %2795  ;;  %v927_v56 = vmul.f32 %v2794_v5, %v810_v31 }
 0xed0   :  { %v944_v60 = vmul.f32 %v2796_v52, %v827_v33 }
 0xf32   :  { %v930_v6 = vpop.permute.xlu1 %929 }
 0xf33   :  { %v932_v57 = vmul.f32 %v2794_v5, %v930_v6  ;;  %v947_v54 = vpop.permute.xlu0 %946 }
 0xf34   :  { %v949_v55 = vmul.f32 %v2796_v52, %v947_v54 }
 0xf35   :  { %934 = vrot.lane.b32.xlu1 %v932_v57, %s2935_s12 }
 0xf36   :  { %951 = vrot.lane.b32.xlu0 %v949_v55, %s2935_s12 }
 0xfa7   :  { %v935_v58 = vpop.permute.xlu1 %934 }
 0xfa8   :  { %v937_v61 = vadd.f32 %v935_v58, %v927_v56  ;;  %v952_v0 = vpop.permute.xlu0 %951 }
 0xfa9   :  { %v954_v9 = vadd.f32 %v952_v0, %v944_v60 }
 0xfaa   :  { %2797 = vtanh.f32 %v937_v61 }
 0xfab   :  { %2799 = vtanh.f32 %v954_v9 }
 0xfb4   :  { %v2798_v14 = vpop.eup %2797 }
 0xfb5   :  { %v2800_v17 = vpop.eup %2799  ;;  %940 = vrot.lane.b32.xlu1 %v2798_v14, %s2934_s3 }
 0xfb6   :  { %957 = vrot.lane.b32.xlu0 %v2800_v17, %s2934_s3 }
0x1027   :  { %v941_v19 = vpop.permute.xlu1 %940 }
0x1028   :  { %v943_v62 = vmul.f32 %v2794_v5, %v941_v19  ;;  %v958_v1 = vpop.permute.xlu0 %957 }
0x1029   :  { %v960_v20 = vmul.f32 %v2796_v52, %v958_v1 }
0x102b   :  { %v961_v22 = vsel %vm163_vm1, %v943_v62, %v960_v20 }
0x102c   :  { %963 = vrot.lane.b32.xlu1 %v961_v22, %s2935_s12 }
0x109e   :  { %v964_v3 = vpop.permute.xlu1 %963 }
0x109f   :  { %2327 = vmatmul.mubr.msk.f32.vlgmr.msra.gmra.mrb[14].mxu0 %vm48_vm0, %v964_v3 }
0x10a0   :  { %2422 = vmatprep.mubr.msk.f32.mxu0 %vm2937_vm2, %v2933_v7 }
0x1172   :  { %v1033_v4 = vpop.f32.mrb[14].mxu0 }
0x1173   :  { %v1038_v23 = vadd.f32 %v1033_v4, %v3107_v8  ;;  %v1035_v24 = vpop.f32.mrb[15].mxu0 }
0x1174   :  { %v1039_v26 = vadd.f32 %v1035_v24, %v3110_v10 }
0x1175   :  { %2801 = vtanh.f32 %v1038_v23  ;;  %v2328_v29 = vmul.f32 -1.442695, %v1038_v23 }
0x1176   :  { %2803 = vtanh.f32 %v1039_v26  ;;  %v2329_v30 = vmul.f32 -1.442695, %v1039_v26 }
0x1177   :  { %2805 = vpow2.f32 %v2328_v29 }
0x1178   :  { %2807 = vpow2.f32 %v2329_v30 }
0x117f   :  { %v2802_v27 = vpop.eup %2801 }
0x1180   :  { %v2804_v28 = vpop.eup %2803  ;;  %1056 = vrot.lane.b32.xlu0 %v2802_v27, %s2934_s3 }
0x1181   :  { %1073 = vrot.lane.b32.xlu1 %v2804_v28, %s2934_s3  ;;  %v2806_v31 = vpop.eup %2805 }
0x1182   :  { %v2808_v32 = vpop.eup %2807  ;;  %v1046_v33 = vadd.f32 1.0, %v2806_v31 }
0x1183   :  { %v1047_v34 = vadd.f32 1.0, %v2808_v32 }
0x1184   :  { %2809 = vrcp.f32 %v1046_v33 }
0x1185   :  { %2811 = vrcp.f32 %v1047_v34 }
0x118e   :  { %v2810_v8 = vpop.eup %2809 }
0x118f   :  { %v2812_v35 = vpop.eup %2811  ;;  %v1054_v63 = vmul.f32 %v2810_v8, %v937_v61 }
0x1190   :  { %v1071_v39 = vmul.f32 %v2812_v35, %v954_v9 }
0x11f2   :  { %v1057_v10 = vpop.permute.xlu0 %1056 }
0x11f3   :  { %v1059_v36 = vmul.f32 %v2810_v8, %v1057_v10  ;;  %v1074_v37 = vpop.permute.xlu1 %1073 }
0x11f4   :  { %v1076_v38 = vmul.f32 %v2812_v35, %v1074_v37 }
0x11f5   :  { %1061 = vrot.lane.b32.xlu0 %v1059_v36, %s2935_s12 }
0x11f6   :  { %1078 = vrot.lane.b32.xlu1 %v1076_v38, %s2935_s12 }
0x1267   :  { %v1062_v2 = vpop.permute.xlu0 %1061 }
0x1268   :  { %v1064_v40 = vadd.f32 %v1062_v2, %v1054_v63  ;;  %v1079_v41 = vpop.permute.xlu1 %1078 }
0x1269   :  { %v3218_v42 = vadd.f32 %v1079_v41, %v1071_v39 }
0x126a   :  { %2813 = vtanh.f32 %v1064_v40 }
0x126b   :  { %2815 = vtanh.f32 %v3218_v42 }
0x1274   :  { %v2814_v43 = vpop.eup %2813 }
0x1275   :  { %v2816_v44 = vpop.eup %2815  ;;  %1067 = vrot.lane.b32.xlu0 %v2814_v43, %s2934_s3 }
0x1276   :  { %1084 = vrot.lane.b32.xlu1 %v2816_v44, %s2934_s3 }
0x12e7   :  { %v1068_v45 = vpop.permute.xlu0 %1067 }
0x12e8   :  { %v1070_v46 = vmul.f32 %v2810_v8, %v1068_v45  ;;  %v1085_v47 = vpop.permute.xlu1 %1084 }
0x12e9   :  { %v1087_v48 = vmul.f32 %v2812_v35, %v1085_v47 }
0x12eb   :  { %v1088_v50 = vsel %vm163_vm1, %v1070_v46, %v1087_v48 }
0x12ec   :  { %1090 = vrot.lane.b32.xlu0 %v1088_v50, %s2935_s12 }
0x135e   :  { %v1091_v51 = vpop.permute.xlu0 %1090 }
0x135f   :  { %2330 = vmatmul.mubr.msk.f32.vlgmr.msra.gmra.mrb[6].mxu1 %vm48_vm0, %v1091_v51 }
0x1360   :  { %2433 = vmatprep.mubr.msk.f32.mxu1 %vm2937_vm2, %v2933_v7 }
0x1432   :  { %v1160_v53 = vpop.f32.mrb[6].mxu1 }
0x1433   :  { %v1165_v5 = vadd.f32 %v1160_v53, %v3113_v11  ;;  %v1162_v6 = vpop.f32.mrb[7].mxu1 }
0x1434   :  { %v3228_v52 = vadd.f32 %v1162_v6, %v3116_v12  ;;  %v2936_v12 = vmov 0.0|0.0  }
0x1435   :  { %2817 = vtanh.f32 %v1165_v5  ;;  %v2331_v54 = vmul.f32 -1.442695, %v1165_v5  ;;  %2620 = vmatprep.subr.bf16.mxu0 %v2936_v12  ;;  %2626 = vmatprep.subr.bf16.mxu1 %v2936_v12 }
0x1436   :  { %2622 = vmatpush3.bf16.msra.mxu0 %v3015_v18  ;;  %2628 = vmatpush3.bf16.msra.mxu1 %v3015_v18 }
0x1437   :  { %2819 = vpow2.f32 %v2331_v54  ;;  %2623 = vmatprep.subr.bf16.mxu0 %v2936_v12  ;;  %2629 = vmatprep.subr.bf16.mxu1 %v2936_v12 }
0x143a   :  { %2625 = vmatpush3.bf16.msra.mxu0 %v3038_v25  ;;  %2631 = vmatpush3.bf16.msra.mxu1 %v3038_v25 }
0x143b   :  { %2632 = vmatprep.subr.bf16.mxu0 %v2936_v12  ;;  %2638 = vmatprep.subr.bf16.mxu1 %v2936_v12 }
0x143f   :  { %v2818_v57 = vpop.eup %2817 }
0x1440   :  { %1183 = vrot.lane.b32.xlu1 %v2818_v57, %s2934_s3 }
0x1441   :  { %v2820_v55 = vpop.eup %2819 }
0x1442   :  { %v1173_v56 = vadd.f32 1.0, %v2820_v55 }
0x1444   :  { %2821 = vrcp.f32 %v1173_v56 }
0x144e   :  { %v2822_v58 = vpop.eup %2821 }
0x144f   :  { %v1181_v0 = vmul.f32 %v2822_v58, %v1064_v40 }
0x14b2   :  { %v1184_v60 = vpop.permute.xlu1 %1183 }
0x14b3   :  { %v1186_v61 = vmul.f32 %v2822_v58, %v1184_v60 }
0x14b5   :  { %1188 = vrot.lane.b32.xlu0 %v1186_v61, %s2935_s12 }
0x1527   :  { %v1189_v11 = vpop.permute.xlu0 %1188 }
0x1528   :  { %v1191_v9 = vadd.f32 %v1189_v11, %v1181_v0 }
0x152a   :  { %2823 = vtanh.f32 %v1191_v9 }
0x1534   :  { %v2824_v14 = vpop.eup %2823 }
0x1535   :  { %1194 = vrot.lane.b32.xlu1 %v2824_v14, %s2934_s3 }
0x15a7   :  { %v1195_v17 = vpop.permute.xlu1 %1194 }
0x15a8   :  { %v1197_v19 = vmul.f32 %v2822_v58, %v1195_v17 }
0x15aa   :  { %1216 = vrot.lane.b32.xlu0 %v1197_v19, %s2935_s12 }
0x161c   :  { %v3248_v62 = vpop.permute.xlu0 %1216 }
0x161d   :  { %2423 = vmatmul.mubr.msk.f32.vlgmr.msra.gmra.mrb[16].mxu0 %vm48_vm0, %v3248_v62 }
0x161e   :  { %2634 = vmatpush3.bf16.msra.mxu0 %v3015_v18  ;;  %2444 = vmatprep.mubr.msk.f32.mxu0 %vm2937_vm2, %v2933_v7 }
0x161f   :  { %2635 = vmatprep.subr.bf16.mxu0 %v2936_v12 }
0x1622   :  { %2637 = vmatpush3.bf16.msra.mxu0 %v3038_v25 }
0x1623   :  { %2644 = vmatprep.subr.bf16.mxu0 %v2936_v12 }
0x16f0   :  { %v1286_v1 = vpop.f32.mrb[16].mxu0 }
0x16f1   :  { %v1290_v20 = vadd.f32 %v1286_v1, %v3078_v59  ;;  %v2424_v22 = vpop.f32.mrb[17].mxu0 }
0x16f3   :  { %2825 = vtanh.f32 %v1290_v20  ;;  %v2334_v4 = vmul.f32 -1.442695, %v1290_v20 }
0x16f5   :  { %2827 = vpow2.f32 %v2334_v4 }
0x16fd   :  { %v2826_v3 = vpop.eup %2825 }
0x16fe   :  { %1300 = vrot.lane.b32.xlu1 %v2826_v3, %s2934_s3 }
0x16ff   :  { %v2828_v23 = vpop.eup %2827 }
0x1700   :  { %v1294_v24 = vadd.f32 1.0, %v2828_v23 }
0x1702   :  { %2829 = vrcp.f32 %v1294_v24 }
0x170c   :  { %v2830_v26 = vpop.eup %2829 }
0x170d   :  { %v1298_v29 = vmul.f32 %v2830_v26, %v1191_v9 }
0x1770   :  { %v1301_v27 = vpop.permute.xlu1 %1300 }
0x1771   :  { %v1303_v28 = vmul.f32 %v2830_v26, %v1301_v27 }
0x1773   :  { %1305 = vrot.lane.b32.xlu0 %v1303_v28, %s2935_s12 }
0x17e5   :  { %v1306_v30 = vpop.permute.xlu0 %1305 }
0x17e6   :  { %v1308_v31 = vadd.f32 %v1306_v30, %v1298_v29 }
0x17e8   :  { %2831 = vtanh.f32 %v1308_v31  ;;  %v1402_v44 = vrot.slane %v1308_v31, 6 }
0x17f2   :  { %v2832_v32 = vpop.eup %2831 }
0x17f3   :  { %1311 = vrot.lane.b32.xlu1 %v2832_v32, %s2934_s3 }
0x1865   :  { %v1312_v33 = vpop.permute.xlu1 %1311 }
0x1866   :  { %v1314_v34 = vmul.f32 %v2830_v26, %v1312_v33 }
0x1868   :  { %1316 = vrot.lane.b32.xlu0 %v1314_v34, %s2935_s12 }
0x18da   :  { %v1317_v8 = vpop.permute.xlu0 %1316 }
0x18db   :  { %2434 = vmatmul.mubr.msk.f32.vlgmr.msra.gmra.mrb[8].mxu1 %vm48_vm0, %v1317_v8 }
0x18dc   :  { %2640 = vmatpush3.bf16.msra.mxu1 %v3015_v18  ;;  %2455 = vmatprep.mubr.msk.f32.mxu1 %vm2937_vm2, %v2933_v7 }
0x18dd   :  { %2641 = vmatprep.subr.bf16.mxu1 %v2936_v12 }
0x18e0   :  { %2643 = vmatpush3.bf16.msra.mxu1 %v3038_v25 }
0x18e1   :  { %2650 = vmatprep.subr.bf16.mxu1 %v2936_v12 }
0x19ae   :  { %v1386_v10 = vpop.f32.mrb[8].mxu1 }
0x19af   :  { %v1391_v35 = vrot.slane %v1386_v10, 6  ;;  %v2435_v36 = vpop.f32.mrb[9].mxu1 }
0x19b1   :  { %v1393_v37 = vadd.f32 %v1391_v35, %v3078_v59 }
0x19b3   :  { %2833 = vtanh.f32 %v1393_v37  ;;  %v2336_v63 = vmul.f32 -1.442695, %v1393_v37 }
0x19b5   :  { %2835 = vpow2.f32 %v2336_v63 }
0x19bd   :  { %v2834_v38 = vpop.eup %2833 }
0x19be   :  { %1406 = vrot.lane.b32.xlu1 %v2834_v38, %s2934_s3 }
0x19bf   :  { %v2836_v2 = vpop.eup %2835 }
0x19c0   :  { %v1397_v39 = vadd.f32 1.0, %v2836_v2 }
0x19c2   :  { %2837 = vrcp.f32 %v1397_v39 }
0x19cc   :  { %v2838_v40 = vpop.eup %2837 }
0x19cd   :  { %v1404_v45 = vmul.f32 %v2838_v40, %v1402_v44 }
0x1a30   :  { %v1407_v41 = vpop.permute.xlu1 %1406 }
0x1a31   :  { %v1409_v43 = vmul.f32 %v2838_v40, %v1407_v41 }
0x1a33   :  { %1411 = vrot.lane.b32.xlu0 %v1409_v43, %s2935_s12 }
0x1aa5   :  { %v1412_v46 = vpop.permute.xlu0 %1411 }
0x1aa6   :  { %v1414_v47 = vadd.f32 %v1412_v46, %v1404_v45 }
0x1aa8   :  { %2839 = vtanh.f32 %v1414_v47  ;;  %v1509_v14 = vrot.slane %v1414_v47, 6 }
0x1ab2   :  { %v2840_v48 = vpop.eup %2839 }
0x1ab3   :  { %1417 = vrot.lane.b32.xlu1 %v2840_v48, %s2934_s3 }
0x1b25   :  { %v1418_v50 = vpop.permute.xlu1 %1417 }
0x1b26   :  { %v1420_v51 = vmul.f32 %v2838_v40, %v1418_v50 }
0x1b28   :  { %v1422_v53 = vrot.slane %v1420_v51, 2 }
0x1b2a   :  { %1423 = vrot.lane.b32.xlu0 %v1422_v53, %s2935_s12 }
0x1b9c   :  { %v1424_v5 = vpop.permute.xlu0 %1423 }
0x1b9d   :  { %2445 = vmatmul.mubr.msk.f32.vlgmr.msra.gmra.mrb[18].mxu0 %vm48_vm0, %v1424_v5 }
0x1b9e   :  { %2646 = vmatpush3.bf16.msra.mxu0 %v3015_v18  ;;  %2466 = vmatprep.mubr.msk.f32.mxu0 %vm2937_vm2, %v2933_v7 }
0x1b9f   :  { %2647 = vmatprep.subr.bf16.mxu0 %v2936_v12 }
0x1ba2   :  { %2649 = vmatpush3.bf16.msra.mxu0 %v3038_v25 }
0x1ba3   :  { %2656 = vmatprep.subr.bf16.mxu0 %v2936_v12 }
0x1c70   :  { %v1493_v6 = vpop.f32.mrb[18].mxu0 }
0x1c71   :  { %v1498_v57 = vrot.slane %v1493_v6, 4  ;;  %v2446_v54 = vpop.f32.mrb[19].mxu0 }
0x1c73   :  { %v1500_v55 = vadd.f32 %v1498_v57, %v3078_v59 }
0x1c75   :  { %2841 = vtanh.f32 %v1500_v55  ;;  %v2338_v58 = vmul.f32 -1.442695, %v1500_v55 }
0x1c77   :  { %2843 = vpow2.f32 %v2338_v58 }
0x1c7f   :  { %v2842_v56 = vpop.eup %2841 }
0x1c80   :  { %1513 = vrot.lane.b32.xlu1 %v2842_v56, %s2934_s3 }
0x1c81   :  { %v2844_v60 = vpop.eup %2843 }
0x1c82   :  { %v1504_v61 = vadd.f32 1.0, %v2844_v60 }
0x1c84   :  { %2845 = vrcp.f32 %v1504_v61 }
0x1c8e   :  { %v2846_v0 = vpop.eup %2845 }
0x1c8f   :  { %v1511_v17 = vmul.f32 %v2846_v0, %v1509_v14 }
0x1cf2   :  { %v1514_v11 = vpop.permute.xlu1 %1513 }
0x1cf3   :  { %v1516_v9 = vmul.f32 %v2846_v0, %v1514_v11 }
0x1cf5   :  { %1518 = vrot.lane.b32.xlu0 %v1516_v9, %s2935_s12 }
0x1d67   :  { %v1519_v19 = vpop.permute.xlu0 %1518 }
0x1d68   :  { %v1521_v1 = vadd.f32 %v1519_v19, %v1511_v17 }
0x1d6a   :  { %2847 = vtanh.f32 %v1521_v1  ;;  %v1616_v10 = vrot.slane %v1521_v1, 6 }
0x1d74   :  { %v2848_v20 = vpop.eup %2847 }
0x1d75   :  { %1524 = vrot.lane.b32.xlu1 %v2848_v20, %s2934_s3 }
0x1de7   :  { %v1525_v22 = vpop.permute.xlu1 %1524 }
0x1de8   :  { %v1527_v3 = vmul.f32 %v2846_v0, %v1525_v22 }
0x1dea   :  { %v1529_v4 = vrot.slane %v1527_v3, 4 }
0x1dec   :  { %1530 = vrot.lane.b32.xlu0 %v1529_v4, %s2935_s12 }
0x1e5e   :  { %v1531_v23 = vpop.permute.xlu0 %1530 }
0x1e5f   :  { %2456 = vmatmul.mubr.msk.f32.vlgmr.msra.gmra.mrb[10].mxu1 %vm48_vm0, %v1531_v23 }
0x1e60   :  { %2652 = vmatpush3.bf16.msra.mxu1 %v3015_v18  ;;  %2477 = vmatprep.mubr.msk.f32.mxu1 %vm2937_vm2, %v2933_v7 }
0x1e61   :  { %2653 = vmatprep.subr.bf16.mxu1 %v2936_v12 }
0x1e64   :  { %2655 = vmatpush3.bf16.msra.mxu1 %v3038_v25 }
0x1e65   :  { %2662 = vmatprep.subr.bf16.mxu1 %v2936_v12 }
0x1f32   :  { %v1600_v24 = vpop.f32.mrb[10].mxu1 }
0x1f33   :  { %v1605_v26 = vrot.slane %v1600_v24, 2  ;;  %v2457_v27 = vpop.f32.mrb[11].mxu1 }
0x1f35   :  { %v1607_v28 = vadd.f32 %v1605_v26, %v3078_v59 }
0x1f37   :  { %2849 = vtanh.f32 %v1607_v28  ;;  %v2340_v30 = vmul.f32 -1.442695, %v1607_v28 }
0x1f39   :  { %2851 = vpow2.f32 %v2340_v30 }
0x1f41   :  { %v2850_v29 = vpop.eup %2849 }
0x1f42   :  { %1620 = vrot.lane.b32.xlu1 %v2850_v29, %s2934_s3  ;;  %v2332_v29 = vmul.f32 -1.442695, %v3228_v52 }
0x1f43   :  { %v2852_v31 = vpop.eup %2851 }
0x1f44   :  { %v1611_v32 = vadd.f32 1.0, %v2852_v31 }
0x1f46   :  { %2853 = vrcp.f32 %v1611_v32 }
0x1f50   :  { %v2854_v33 = vpop.eup %2853 }
0x1f51   :  { %v1618_v35 = vmul.f32 %v2854_v33, %v1616_v10 }
0x1fb4   :  { %v1621_v34 = vpop.permute.xlu1 %1620 }
0x1fb5   :  { %v1623_v8 = vmul.f32 %v2854_v33, %v1621_v34 }
0x1fb7   :  { %1625 = vrot.lane.b32.xlu0 %v1623_v8, %s2935_s12 }
0x2029   :  { %v1626_v36 = vpop.permute.xlu0 %1625 }
0x202a   :  { %v1628_v37 = vadd.f32 %v1626_v36, %v1618_v35 }
0x202c   :  { %2855 = vtanh.f32 %v1628_v37  ;;  %v1720_v53 = vrot.slane %v1628_v37, 6 }
0x2036   :  { %v2856_v59 = vpop.eup %2855 }
0x2037   :  { %1631 = vrot.lane.b32.xlu1 %v2856_v59, %s2934_s3 }
0x20a9   :  { %v1632_v38 = vpop.permute.xlu1 %1631 }
0x20aa   :  { %v1634_v63 = vmul.f32 %v2854_v33, %v1632_v38 }
0x20ac   :  { %v1636_v2 = vrot.slane %v1634_v63, 6 }
0x20ae   :  { %1637 = vrot.lane.b32.xlu0 %v1636_v2, %s2935_s12 }
0x2120   :  { %v1638_v39 = vpop.permute.xlu0 %1637 }
0x2121   :  { %2467 = vmatmul.mubr.msk.f32.vlgmr.msra.gmra.mrb[20].mxu0 %vm48_vm0, %v1638_v39 }
0x2122   :  { %2658 = vmatpush3.bf16.msra.mxu0 %v3015_v18  ;;  %2488 = vmatprep.mubr.msk.f32.mxu0 %vm2937_vm2, %v2933_v7 }
0x2123   :  { %2659 = vmatprep.subr.bf16.mxu0 %v2936_v12 }
0x2126   :  { %2661 = vmatpush3.bf16.msra.mxu0 %v3038_v25 }
0x2127   :  { %2668 = vmatprep.subr.bf16.mxu0 %v2936_v12 }
0x21f4   :  { %v1707_v40 = vpop.f32.mrb[20].mxu0 }
0x21f5   :  { %v1711_v41 = vadd.f32 %v1707_v40, %v3118_v13  ;;  %v2468_v43 = vpop.f32.mrb[21].mxu0 }
0x21f7   :  { %2857 = vtanh.f32 %v1711_v41  ;;  %v2342_v45 = vmul.f32 -1.442695, %v1711_v41 }
0x21f9   :  { %2859 = vpow2.f32 %v2342_v45 }
0x2201   :  { %v2858_v44 = vpop.eup %2857 }
0x2202   :  { %1724 = vrot.lane.b32.xlu1 %v2858_v44, %s2934_s3 }
0x2203   :  { %v2860_v46 = vpop.eup %2859 }
0x2204   :  { %v1715_v47 = vadd.f32 1.0, %v2860_v46 }
0x2206   :  { %2861 = vrcp.f32 %v1715_v47 }
0x2210   :  { %v2862_v48 = vpop.eup %2861 }
0x2211   :  { %v1722_v5 = vmul.f32 %v2862_v48, %v1720_v53 }
0x2274   :  { %v1725_v50 = vpop.permute.xlu1 %1724 }
0x2275   :  { %v1727_v51 = vmul.f32 %v2862_v48, %v1725_v50 }
0x2277   :  { %1729 = vrot.lane.b32.xlu0 %v1727_v51, %s2935_s12 }
0x22e9   :  { %v1730_v6 = vpop.permute.xlu0 %1729 }
0x22ea   :  { %v1732_v57 = vadd.f32 %v1730_v6, %v1722_v5 }
0x22ec   :  { %2863 = vtanh.f32 %v1732_v57 }
0x22f6   :  { %v2864_v54 = vpop.eup %2863 }
0x22f7   :  { %1735 = vrot.lane.b32.xlu1 %v2864_v54, %s2934_s3 }
0x2369   :  { %v1736_v55 = vpop.permute.xlu1 %1735 }
0x236a   :  { %v1738_v56 = vmul.f32 %v2862_v48, %v1736_v55 }
0x236c   :  { %1740 = vrot.lane.b32.xlu0 %v1738_v56, %s2935_s12 }
0x23de   :  { %v1741_v58 = vpop.permute.xlu0 %1740 }
0x23df   :  { %2478 = vmatmul.mubr.msk.f32.vlgmr.msra.gmra.mrb[12].mxu1 %vm48_vm0, %v1741_v58 }
0x23e0   :  { %2664 = vmatpush3.bf16.msra.mxu1 %v3015_v18  ;;  %2499 = vmatprep.mubr.msk.f32.mxu1 %vm2937_vm2, %v2933_v7 }
0x23e1   :  { %2665 = vmatprep.subr.bf16.mxu1 %v2936_v12 }
0x23e4   :  { %2667 = vmatpush3.bf16.msra.mxu1 %v3038_v25  ;;  %v1826_v25 = vrot.slane %v1732_v57, 6 }
0x23e5   :  { %2674 = vmatprep.subr.bf16.mxu1 %v2936_v12 }
0x24b2   :  { %v1810_v60 = vpop.f32.mrb[12].mxu1 }
0x24b3   :  { %v1815_v61 = vrot.slane %v1810_v60, 6  ;;  %v2479_v0 = vpop.f32.mrb[13].mxu1 }
0x24b5   :  { %v1817_v11 = vadd.f32 %v1815_v61, %v3118_v13 }
0x24b7   :  { %2865 = vtanh.f32 %v1817_v11  ;;  %v2344_v14 = vmul.f32 -1.442695, %v1817_v11 }
0x24b9   :  { %2867 = vpow2.f32 %v2344_v14 }
0x24c1   :  { %v2866_v9 = vpop.eup %2865 }
0x24c2   :  { %1830 = vrot.lane.b32.xlu1 %v2866_v9, %s2934_s3 }
0x24c3   :  { %v2868_v18 = vpop.eup %2867 }
0x24c4   :  { %v1821_v17 = vadd.f32 1.0, %v2868_v18 }
0x24c6   :  { %2869 = vrcp.f32 %v1821_v17 }
0x24d0   :  { %v2870_v19 = vpop.eup %2869 }
0x24d1   :  { %v1828_v22 = vmul.f32 %v2870_v19, %v1826_v25 }
0x2534   :  { %v1831_v1 = vpop.permute.xlu1 %1830 }
0x2535   :  { %v1833_v20 = vmul.f32 %v2870_v19, %v1831_v1 }
0x2537   :  { %1835 = vrot.lane.b32.xlu0 %v1833_v20, %s2935_s12 }
0x25a9   :  { %v1836_v3 = vpop.permute.xlu0 %1835 }
0x25aa   :  { %v1838_v4 = vadd.f32 %v1836_v3, %v1828_v22 }
0x25ac   :  { %2871 = vtanh.f32 %v1838_v4  ;;  %v1933_v47 = vrot.slane %v1838_v4, 6 }
0x25ad   :  { %2873 = vtanh.f32 %v3228_v52 }
0x25ae   :  { %2875 = vpow2.f32 %v2332_v29 }
0x25b6   :  { %v2872_v23 = vpop.eup %2871 }
0x25b7   :  { %1841 = vrot.lane.b32.xlu1 %v2872_v23, %s2934_s3  ;;  %v2874_v28 = vpop.eup %2873 }
0x25b8   :  { %v2876_v30 = vpop.eup %2875 }
0x25b9   :  { %v1174_v31 = vadd.f32 1.0, %v2876_v30 }
0x25bb   :  { %2877 = vrcp.f32 %v1174_v31 }
0x25c5   :  { %v2878_v33 = vpop.eup %2877 }
0x25c6   :  { %v1198_v52 = vmul.f32 %v2878_v33, %v3218_v42 }
0x2629   :  { %v1842_v24 = vpop.permute.xlu1 %1841 }
0x262a   :  { %v1844_v26 = vmul.f32 %v2870_v19, %v1842_v24 }
0x262c   :  { %v1846_v27 = vrot.slane %v1844_v26, 2 }
0x262e   :  { %1847 = vrot.lane.b32.xlu0 %v1846_v27, %s2935_s12 }
0x2632   :  { %1200 = vrot.lane.b32.xlu0 %v2874_v28, %s2934_s3 }
0x26a0   :  { %v1848_v32 = vpop.permute.xlu0 %1847 }
0x26a1   :  { %2489 = vmatmul.mubr.msk.f32.vlgmr.msra.gmra.mrb[22].mxu0 %vm48_vm0, %v1848_v32 }
0x26a2   :  { %2670 = vmatpush3.bf16.msra.mxu0 %v3010_v16  ;;  %2510 = vmatprep.mubr.msk.f32.mxu0 %vm2937_vm2, %v2933_v7 }
0x26a3   :  { %2671 = vmatprep.subr.bf16.mxu0 %v2936_v12 }
0x26a4   :  { %v1201_v34 = vpop.permute.xlu0 %1200 }
0x26a5   :  { %v1203_v8 = vmul.f32 %v2878_v33, %v1201_v34 }
0x26a6   :  { %2673 = vmatpush3.bf16.msra.mxu0 %v3023_v21 }
0x26a7   :  { %1205 = vrot.lane.b32.xlu0 %v1203_v8, %s2935_s12  ;;  %v2186_v8 = vld [vmem:[%s3438_s4 + $0x8] sm:$0xff] }
0x2719   :  { %v1206_v10 = vpop.permute.xlu0 %1205 }
0x271a   :  { %v1208_v35 = vadd.f32 %v1206_v10, %v1198_v52  ;;  %v2187_v52 = vld [vmem:[%s3438_s4 + $0x10] sm:$0xff] }
0x271c   :  { %2879 = vtanh.f32 %v1208_v35  ;;  %v2147_v17 = vrot.slane %v1208_v35, 4  ;;  %v2188_v35 = vld [vmem:[%s3438_s4 + $0x18] sm:$0xff] }
0x2726   :  { %v2880_v36 = vpop.eup %2879 }
0x2727   :  { %1211 = vrot.lane.b32.xlu0 %v2880_v36, %s2934_s3  ;;  %v2678_v36 = vpack.c.bf16 %v2188_v35, %v2187_v52 }
0x2774   :  { %v1917_v16 = vpop.f32.mrb[22].mxu0 }
0x2775   :  { %v1922_v37 = vrot.slane %v1917_v16, 4  ;;  %v2490_v59 = vpop.f32.mrb[23].mxu0  ;;  %v2189_v16 = vld [vmem:[%s3438_s4 + $0x20] sm:$0xff] }
0x2777   :  { %v1924_v38 = vadd.f32 %v1922_v37, %v3118_v13  ;;  %v2190_v37 = vld [vmem:[%s3438_s4 + $0x28] sm:$0xff] }
0x2778   :  { %v2681_v59 = vpack.c.bf16 %v2190_v37, %v2189_v16 }
0x2779   :  { %2881 = vtanh.f32 %v1924_v38  ;;  %v2346_v42 = vmul.f32 -1.442695, %v1924_v38 }
0x277b   :  { %2883 = vpow2.f32 %v2346_v42  ;;  %v2193_v42 = vld [vmem:[%s3438_s4 + $0x40] sm:$0xff] }
0x2783   :  { %v2882_v63 = vpop.eup %2881 }
0x2784   :  { %1937 = vrot.lane.b32.xlu1 %v2882_v63, %s2934_s3  ;;  %v2191_v63 = vld [vmem:[%s3438_s4 + $0x30] sm:$0xff] }
0x2785   :  { %v2884_v40 = vpop.eup %2883 }
0x2786   :  { %v1928_v41 = vadd.f32 1.0, %v2884_v40  ;;  %v2194_v40 = vld [vmem:[%s3438_s4 + $0x48] sm:$0xff] }
0x2788   :  { %2885 = vrcp.f32 %v1928_v41  ;;  %v2687_v41 = vpack.c.bf16 %v2194_v40, %v2193_v42 }
0x2792   :  { %v2886_v43 = vpop.eup %2885 }
0x2793   :  { %v1935_v48 = vmul.f32 %v2886_v43, %v1933_v47 }
0x2799   :  { %v1212_v21 = vpop.permute.xlu0 %1211 }
0x279a   :  { %v1214_v2 = vmul.f32 %v2878_v33, %v1212_v21  ;;  %v2192_v21 = vld [vmem:[%s3438_s4 + $0x38] sm:$0xff] }
0x279c   :  { %v2060_v39 = vrot.slane %v1214_v2, 2  ;;  %v2168_v2 = vrot.slane %v3128_v49, 2  ;;  %v2195_v49 = vld [vmem:[%s3438_s4 + $0x50] sm:$0xff] }
0x279e   :  { %2061 = vrot.lane.b32.xlu0 %v2060_v39, %s2935_s12  ;;  %v2684_v39 = vpack.c.bf16 %v2192_v21, %v2191_v63 }
0x27f6   :  { %v1938_v44 = vpop.permute.xlu1 %1937 }
0x27f7   :  { %v1940_v45 = vmul.f32 %v2886_v43, %v1938_v44 }
0x27f9   :  { %1942 = vrot.lane.b32.xlu1 %v1940_v45, %s2935_s12  ;;  %v2197_v45 = vld [vmem:[%s3438_s4 + $0x60] sm:$0xff] }
0x2810   :  { %v2062_v46 = vpop.permute.xlu0 %2061 }
0x2811   :  { %2511 = vmatmul.mubr.msk.f32.vlgmr.msra.gmra.mrb[24].mxu0 %vm48_vm0, %v2062_v46  ;;  %v2198_v46 = vld [vmem:[%s3438_s4 + $0x68] sm:$0xff] }
0x2812   :  { %v2693_v47 = vpack.c.bf16 %v2198_v46, %v2197_v45 }
0x286b   :  { %v1943_v50 = vpop.permute.xlu1 %1942 }
0x286c   :  { %v1945_v51 = vadd.f32 %v1943_v50, %v1935_v48  ;;  %v2199_v48 = vld [vmem:[%s3438_s4 + $0x70] sm:$0xff]  ;;  %v2200_v50 = vld [vmem:[%s3438_s4 + $0x78] sm:$0xff] }
0x286e   :  { %2887 = vtanh.f32 %v1945_v51  ;;  %v2040_v31 = vrot.slane %v1945_v51, 6  ;;  %v2696_v51 = vpack.c.bf16 %v2200_v50, %v2199_v48 }
0x2878   :  { %v2888_v53 = vpop.eup %2887 }
0x2879   :  { %1948 = vrot.lane.b32.xlu1 %v2888_v53, %s2934_s3 }
0x28e4   :  { %v2131_v5 = vpop.f32.mrb[24].mxu0 }
0x28e5   :  { %v2136_v6 = vrot.slane %v2131_v5, 2  ;;  %v2512_v57 = vpop.f32.mrb[25].mxu0 }
0x28e7   :  { %v2138_v54 = vadd.f32 %v2136_v6, %v3120_v15 }
0x28e9   :  { %2889 = vtanh.f32 %v2138_v54  ;;  %v2350_v61 = vmul.f32 -1.442695, %v2138_v54 }
0x28eb   :  { %v1949_v55 = vpop.permute.xlu1 %1948  ;;  %2891 = vpow2.f32 %v2350_v61 }
0x28ec   :  { %v1951_v56 = vmul.f32 %v2886_v43, %v1949_v55  ;;  %v2196_v43 = vld [vmem:[%s3438_s4 + $0x58] sm:$0xff] }
0x28ed   :  { %v2690_v44 = vpack.c.bf16 %v2196_v43, %v2195_v49 }
0x28ee   :  { %v1953_v58 = vrot.slane %v1951_v56, 4 }
0x28f0   :  { %1954 = vrot.lane.b32.xlu1 %v1953_v58, %s2935_s12 }
0x28f3   :  { %v2890_v60 = vpop.eup %2889 }
0x28f4   :  { %2151 = vrot.lane.b32.xlu0 %v2890_v60, %s2934_s3 }
0x28f5   :  { %v2892_v0 = vpop.eup %2891 }
0x28f6   :  { %v2142_v11 = vadd.f32 1.0, %v2892_v0 }
0x28f8   :  { %2893 = vrcp.f32 %v2142_v11 }
0x2902   :  { %v3347_v15 = vpop.eup %2893 }
0x2903   :  { %v2149_v19 = vmul.f32 %v3347_v15, %v2147_v17 }
0x2962   :  { %v1955_v9 = vpop.permute.xlu1 %1954 }
0x2963   :  { %2500 = vmatmul.mubr.msk.f32.vlgmr.msra.gmra.mrb[14].mxu1 %vm48_vm0, %v1955_v9 }
0x2964   :  { %2545 = vmatprep.mubr.msk.f32.mxu1 %vm2937_vm2, %v2933_v7 }
0x2966   :  { %v2152_v14 = vpop.permute.xlu0 %2151 }
0x2967   :  { %v2154_v18 = vmul.f32 %v3347_v15, %v2152_v14 }
0x2969   :  { %2156 = vrot.lane.b32.xlu0 %v2154_v18, %s2935_s12 }
0x29db   :  { %v2157_v1 = vpop.permute.xlu0 %2156 }
0x29dc   :  { %v2159_v20 = vadd.f32 %v2157_v1, %v2149_v19 }
0x29de   :  { %2895 = vtanh.f32 %v2159_v20 }
0x29e8   :  { %v2896_v25 = vpop.eup %2895 }
0x29e9   :  { %2162 = vrot.lane.b32.xlu0 %v2896_v25, %s2934_s3 }
0x2a36   :  { %v2024_v22 = vpop.f32.mrb[14].mxu1 }
0x2a37   :  { %v2029_v3 = vrot.slane %v2024_v22, 2  ;;  %v2501_v4 = vpop.f32.mrb[15].mxu1 }
0x2a39   :  { %v2031_v7 = vadd.f32 %v2029_v3, %v3118_v13  ;;  %v2185_v13 = vld [vmem:[%s3438_s4] sm:$0xff] }
0x2a3a   :  { %v2675_v10 = vpack.c.bf16 %v2186_v8, %v2185_v13 }
0x2a3b   :  { %2897 = vtanh.f32 %v2031_v7  ;;  %v2348_v24 = vmul.f32 -1.442695, %v2031_v7 }
0x2a3c   :  { %2676 = vmatpush3.bf16.msra.mxu1 %v2675_v10 }
0x2a3d   :  { %2899 = vpow2.f32 %v2348_v24  ;;  %2677 = vmatprep.subr.bf16.mxu1 %v2936_v12 }
0x2a40   :  { %2679 = vmatpush3.bf16.msra.mxu1 %v2678_v36 }
0x2a41   :  { %2680 = vmatprep.subr.bf16.mxu1 %v2936_v12 }
0x2a44   :  { %2682 = vmatpush3.bf16.msra.mxu1 %v2681_v59 }
0x2a45   :  { %v2898_v23 = vpop.eup %2897  ;;  %2683 = vmatprep.subr.bf16.mxu1 %v2936_v12 }
0x2a46   :  { %2044 = vrot.lane.b32.xlu1 %v2898_v23, %s2934_s3 }
0x2a47   :  { %v2900_v26 = vpop.eup %2899 }
0x2a48   :  { %v2035_v27 = vadd.f32 1.0, %v2900_v26  ;;  %2685 = vmatpush3.bf16.msra.mxu1 %v2684_v39 }
0x2a49   :  { %2686 = vmatprep.subr.bf16.mxu1 %v2936_v12 }
0x2a4a   :  { %2901 = vrcp.f32 %v2035_v27 }
0x2a4c   :  { %2688 = vmatpush3.bf16.msra.mxu1 %v2687_v41 }
0x2a4d   :  { %2689 = vmatprep.subr.bf16.mxu1 %v2936_v12 }
0x2a50   :  { %2691 = vmatpush3.bf16.msra.mxu1 %v2690_v44 }
0x2a51   :  { %2692 = vmatprep.subr.bf16.mxu1 %v2936_v12 }
0x2a54   :  { %v2902_v28 = vpop.eup %2901  ;;  %2694 = vmatpush3.bf16.msra.mxu1 %v2693_v47 }
0x2a55   :  { %v2042_v32 = vmul.f32 %v2902_v28, %v2040_v31  ;;  %2695 = vmatprep.subr.bf16.mxu1 %v2936_v12  ;;  %v2351_v12 = vld [vmem:[%s3439_s5] ss:$0 sm:$0xff]  ;;  %s2909_s5 = scalar_lea.vmem %s2299_s20, 32 }
0x2a56   :  { %p2910_p0 = scmp.ne.s32.totalorder %s2299_s20, %s2909_s5  ;;  %p2915_p2 = scmp.lt.s32.totalorder %s2909_s5, %s2909_s5 }
0x2a58   :  { %2697 = vmatpush3.bf16.msra.mxu1 %v2696_v51  ;;  %p2916_p3 = por %p2915_p2, %p2914_p1 }
0x2a5a   :  { %p2917_p4 = pnand %p2916_p3, %p2910_p0 }
0x2a5b   :  { %v2163_v57 = vpop.permute.xlu0 %2162 }
0x2a5c   :  { %v2165_v54 = vmul.f32 %v3347_v15, %v2163_v57 }
0x2a5e   :  { %v2178_v56 = vrot.slane %v2165_v54, 6 }
0x2ab8   :  { %v2045_v29 = vpop.permute.xlu1 %2044 }
0x2ab9   :  { %v2047_v30 = vmul.f32 %v2902_v28, %v2045_v29 }
0x2abb   :  { %2049 = vrot.lane.b32.xlu1 %v2047_v30, %s2935_s12 }
0x2b2d   :  { %v2050_v33 = vpop.permute.xlu1 %2049 }
0x2b2e   :  { %v2052_v34 = vadd.f32 %v2050_v33, %v2042_v32 }
0x2b30   :  { %2903 = vtanh.f32 %v2052_v34 }
0x2b3a   :  { %v2904_v38 = vpop.eup %2903 }
0x2b3b   :  { %2055 = vrot.lane.b32.xlu1 %v2904_v38, %s2934_s3 }
0x2b3f   :  { %2169 = vrot.lane.b32.xlu1 %v2168_v2, %s2934_s3 }
0x2bad   :  { %v2056_v53 = vpop.permute.xlu1 %2055 }
0x2bae   :  { %v2058_v5 = vmul.f32 %v2902_v28, %v2056_v53 }
0x2bb0   :  { %v2173_v6 = vrot.slane %v2058_v5, 6 }
0x2bb1   :  { %v2170_v55 = vpop.permute.xlu1 %2169 }
0x2bb2   :  { %2174 = vrot.lane.b32.xlu0 %v2173_v6, %s2938_s17  ;;  %v2180_v58 = vsel %vm48_vm0, %v3248_v62, %v2170_v55 }
0x2c24   :  { %v2175_v60 = vpop.permute.xlu0 %2174 }
0x2c25   :  { %v2182_v61 = vsel %vm2181_vm3, %v2180_v58, %v2175_v60 }
0x2c26   :  { %v2184_v0 = vsel %vm2183_vm4, %v2182_v61, %v2178_v56 }
0x2c27   :  { %2546 = vmatmul.mubr.f32.vlgmr.msra.gmra.mrb[16].mxu1 %v2184_v0 }
0x2cfa   :  { %v2274_v11 = vpop.f32.mrb[16].mxu1 }
0x2cfb   :  { %v2275_v9 = vadd.f32 %v2351_v12, %v2274_v11  ;;  %v2547_v14 = vpop.f32.mrb[17].mxu1 }
0x2cfd   :  { %v2278_v15 = vsel %vm163_vm1, %v2275_v9, -inf }
0x2cfe   :  { %2279 = vmax.xlane.f32.xlu1 %v2278_v15 }
0x2d8b   :  { %v2280_v18 = vpop.xlane.xlu1 %2279 }
0x2d8c   :  { %v2281_v17 = vsub.f32 %v2275_v9, %v2280_v18 }
0x2d8e   :  { %v2282_v19 = vmul.f32 1.442695, %v2281_v17 }
0x2d90   :  { %2905 = vpow2.f32 %v2282_v19 }
0x2d9a   :  { %v2906_v1 = vpop.eup %2905 }
0x2d9b   :  { %v2284_v62 = vsel %vm163_vm1, %v2906_v1, 0.0 }
0x2d9c   :  { %2285 = vadd.xlane.f32.xlu0 %v2284_v62 }
0x2e29   :  { %v2286_v20 = vpop.xlane.xlu0 %2285 }
0x2e2a   :  { %2907 = vlog2.f32 %v2286_v20 }
0x2e34   :  { %v2908_v25 = vpop.eup %2907 }
0x2e35   :  { %v2288_v22 = vmul.f32 0.6931472, %v2908_v25 }
0x2e37   :  { %v2289_v3 = vsub.f32 %v2281_v17, %v2288_v22 }
0x2e39   :  { %2291 = vst.msk [vmem:[#allocation2] sm:$0x3] %vm2290_vm5, %v2289_v3 }
0x2e3a   :  { %2920 = shalt.err (!%p2917_p4)
}
0x2e3b   :  { %s2921_s22 = scalar_lea.hbm %s3440_s6, 32 }
0x2e3c   :  { %p2922_p5 = scmp.ne.s32.totalorder %s3440_s6, %s2921_s22  ;;  %p2925_p6 = scmp.lt.u32.totalorder %s2921_s22, %s3440_s6 }
0x2e3e   :  { %p2927_p7 = pnand %p2925_p6, %p2922_p5 }
0x2e40   :  { %2930 = shalt.err (!%p2927_p7)
}
0x2e41   :  { %2301 = dma.vmem_to_hbm [thread:$0]  %s2299_s20, 32, %s3440_s6, [#allocation3]  }
0x2e42   :  { %2931 = dma.done.wait [#allocation3], 32  }
0x2e43   :  { %2932 = vsyncadd [#allocation3], 4294967264 }
0x2e44   :  { %2305 = vsyncpa [#allocation3], 1 }

</bundles_post_ra>
